<compile_context>
chip_gen: v7x
topology: tpu7x:2x2x1
jax: 0.10.0
libtpu: 0.0.40
codegen_flags: <defaults>
</compile_context>

<pallas_src>
import jax
import jax.numpy as jnp
from jax.experimental import pallas as pl
from jax.experimental.pallas import tpu as pltpu

GATE_PAD = 128   # each gate block / LHS segment padded to one 128-lane vreg


def seq2seq_kernel(
    tok_ref,      # VMEM (B, 1)        int32 token ids for the single time step
    w_big_ref,    # VMEM (3G, 8G) bf16 fused [emb@W_ih | W_hh | biases] block weight
    h_ref,        # VMEM (2, B, H) f32 hidden [fwd, bwd] (aliased to h_out_ref)
    fc_ref,       # VMEM (2H+1, O) f32 rows 0:2H = W_fc^T, row 2H = b_fc
    out_ref,      # VMEM (B, O)    f32 logits
    h_out_ref,    # VMEM (2, B, H) f32 new hidden
    xin_ref,      # VMEM (B, 3G)   f32 scratch: fused matmul LHS
):
    B = h_ref.shape[1]
    H = h_ref.shape[2]
    G = w_big_ref.shape[0] // 3          # padded gate / segment width (= 128)

    # ---- assemble fused LHS [one_hot(tok) | h_fwd, 1 | h_bwd] (128-aligned segments) ----
    lane = jax.lax.broadcasted_iota(jnp.int32, (B, 3 * G), 1)
    one_hot = (lane == tok_ref[...]).astype(xin_ref.dtype)      # token one-hot in segment 0
    bias_one = (lane == (G + H)).astype(xin_ref.dtype)          # constant-1 lane: biases live in w_big
    xin_ref[...] = one_hot + bias_one                           # also zero-fills all padding lanes
    xin_ref[:, G:G + H] = h_ref[0]                              # lane-offset-0 store inside segment 1
    xin_ref[:, 2 * G:2 * G + H] = h_ref[1]                      # lane-offset-0 store inside segment 2

    # ---- ONE MXU matmul = embedding gather + input proj + both recurrent projs + biases ----
    g = jnp.dot(xin_ref[...].astype(jnp.bfloat16), w_big_ref[...],
                preferred_element_type=jnp.float32)             # (B, 8G) f32

    # Output blocks (each G wide, live data in first H lanes):
    #   4d+0: i_r + h_r + b_ir + b_hr     4d+1: i_z + h_z + b_iz + b_hz
    #   4d+2: i_n + b_in                  4d+3: h_n + b_hn   (kept separate: scaled by r)
    def gru_dir(d, h_prev):
        c = 4 * d * G
        r = jax.nn.sigmoid(g[:, c:c + H])
        z = jax.nn.sigmoid(g[:, c + G:c + G + H])
        n = jnp.tanh(g[:, c + 2 * G:c + 2 * G + H] + r * g[:, c + 3 * G:c + 3 * G + H])
        return (1.0 - z) * n + z * h_prev                       # f32 gate math (v5e-safe)

    # All reads of the (aliased) h_ref happen before any write to h_out_ref.
    new_h_f = gru_dir(0, h_ref[0])
    new_h_b = gru_dir(1, h_ref[1])
    h_out_ref[0] = new_h_f
    h_out_ref[1] = new_h_b

    # ---- fc on [h_f | h_b]: two sublane-sliced matmuls summed (no lane-axis concat) ----
    out_ref[...] = (
        jnp.dot(new_h_f, fc_ref[0:H, :], preferred_element_type=jnp.float32)
        + jnp.dot(new_h_b, fc_ref[H:2 * H, :], preferred_element_type=jnp.float32)
        + fc_ref[2 * H:2 * H + 1, :]
    )


@jax.jit
def seq2seq_forward(token_ids, hidden, params):
    """token_ids: (1, B) int32; hidden: (2, B, H) f32 -> (logits (B, O), hidden (2, B, H))."""
    B = token_ids.shape[1]
    H = hidden.shape[-1]
    O = params["fc_packed"].shape[1]
    KP = params["w_big"].shape[0]        # 3 * GATE_PAD

    vmem = pl.BlockSpec(memory_space=pltpu.MemorySpace.VMEM)

    out, new_hidden = pl.pallas_call(
        seq2seq_kernel,
        out_shape=(
            jax.ShapeDtypeStruct((B, O), jnp.float32),
            jax.ShapeDtypeStruct((2, B, H), jnp.float32),
        ),
        in_specs=[vmem, vmem, vmem, vmem],
        out_specs=(vmem, vmem),
        scratch_shapes=[pltpu.VMEM((B, KP), jnp.float32)],
        input_output_aliases={2: 1},     # hidden state is read-modify-write in place
    )(
        token_ids[0].astype(jnp.int32).reshape(B, 1),
        params["w_big"],
        hidden,
        params["fc_packed"],
    )
    return out, new_hidden


def _reference_forward(token_ids, hidden, raw):
    """Pure-JAX reference with PyTorch-native (unpacked, f32) parameters."""
    x = raw["embedding"][token_ids[0]]                           # dropout = identity at eval

    def cell(x, h, w_ih, w_hh, b_ih, b_hh):
        gi = x @ w_ih.T + b_ih
        gh = h @ w_hh.T + b_hh
        i_r, i_z, i_n = jnp.split(gi, 3, axis=-1)
        h_r, h_z, h_n = jnp.split(gh, 3, axis=-1)
        r = jax.nn.sigmoid(i_r + h_r)
        z = jax.nn.sigmoid(i_z + h_z)
        n = jnp.tanh(i_n + r * h_n)
        return (1.0 - z) * n + z * h

    h_f = cell(x, hidden[0], raw["w_ih_f"], raw["w_hh_f"], raw["b_ih_f"], raw["b_hh_f"])
    h_b = cell(x, hidden[1], raw["w_ih_b"], raw["w_hh_b"], raw["b_ih_b"], raw["b_hh_b"])
    out = jnp.concatenate([h_f, h_b], axis=-1) @ raw["w_fc"].T + raw["b_fc"]
    return out, jnp.stack([h_f, h_b], axis=0)


def init_params(key, input_size, hidden_size, output_size, gate_pad=GATE_PAD):
    """Synthetic PyTorch-shaped params + the fused/packed kernel operands."""
    V, H, O, G = input_size, hidden_size, output_size, gate_pad
    assert V <= G and H < G, "vocab / hidden must fit inside one padded 128-lane segment"

    ks = jax.random.split(key, 11)
    bound = 1.0 / jnp.sqrt(jnp.float32(H))
    u = lambda k, shape: jax.random.uniform(k, shape, jnp.float32, -bound, bound)

    raw = {
        "embedding": u(ks[0], (V, H)),                    # nn.Embedding weight
        "w_ih_f": u(ks[1], (3 * H, H)), "w_hh_f": u(ks[2], (3 * H, H)),
        "b_ih_f": u(ks[3], (3 * H,)),   "b_hh_f": u(ks[4], (3 * H,)),
        "w_ih_b": u(ks[5], (3 * H, H)), "w_hh_b": u(ks[6], (3 * H, H)),
        "b_ih_b": u(ks[7], (3 * H,)),   "b_hh_b": u(ks[8], (3 * H,)),
        "w_fc": u(ks[9], (O, 2 * H)),   "b_fc": u(ks[10], (O,)),
    }

    # ---- fused block weight (3G, 8G): rows = [one_hot(V) | h_f, bias-1 | h_b] ----
    w_big = jnp.zeros((3 * G, 8 * G), jnp.float32)
    bias_row = G + H                                       # the constant-1 lane of the LHS
    per_dir = [
        (raw["w_ih_f"], raw["w_hh_f"], raw["b_ih_f"], raw["b_hh_f"], G),      # fwd: h in segment 1
        (raw["w_ih_b"], raw["w_hh_b"], raw["b_ih_b"], raw["b_hh_b"], 2 * G),  # bwd: h in segment 2
    ]
    for d, (w_ih, w_hh, b_ih, b_hh, hrow) in enumerate(per_dir):
        ei = raw["embedding"] @ w_ih.T                     # (V, 3H): embedding folded into input proj
        hh = w_hh.T                                        # (H, 3H)
        base = 4 * d * G
        for gate in range(3):                              # 0=r, 1=z, 2=n
            ei_g = ei[:, gate * H:(gate + 1) * H]
            hh_g = hh[:, gate * H:(gate + 1) * H]
            bi_g = b_ih[gate * H:(gate + 1) * H]
            bh_g = b_hh[gate * H:(gate + 1) * H]
            if gate < 2:                                   # r, z: i + h + both biases in one block
                col = base + gate * G
                w_big = w_big.at[0:V, col:col + H].set(ei_g)
                w_big = w_big.at[hrow:hrow + H, col:col + H].set(hh_g)
                w_big = w_big.at[bias_row, col:col + H].set(bi_g + bh_g)
            else:                                          # n: i_n and h_n kept in separate blocks
                col_i = base + 2 * G
                col_h = base + 3 * G
                w_big = w_big.at[0:V, col_i:col_i + H].set(ei_g)
                w_big = w_big.at[bias_row, col_i:col_i + H].set(bi_g)
                w_big = w_big.at[hrow:hrow + H, col_h:col_h + H].set(hh_g)
                w_big = w_big.at[bias_row, col_h:col_h + H].set(bh_g)

    fc_packed = jnp.zeros((2 * H + 1, O), jnp.float32)
    fc_packed = fc_packed.at[0:2 * H, :].set(raw["w_fc"].T)
    fc_packed = fc_packed.at[2 * H, :].set(raw["b_fc"])

    kernel_params = {
        "w_big": w_big.astype(jnp.bfloat16),   # bf16: native MXU dtype, halves per-call DMA bytes
        "fc_packed": fc_packed,
    }
    return kernel_params, raw


if __name__ == "__main__":
    input_size = 16     # vocab
    hidden_size = 32
    output_size = 16
    batch = 8
    seq_len = 1         # forward uses output.squeeze(0) => single-step decoding

    key = jax.random.PRNGKey(0)
    k_param, k_tok1, k_tok2 = jax.random.split(key, 3)

    kparams, raw = init_params(k_param, input_size, hidden_size, output_size)
    tok1 = jax.random.randint(k_tok1, (seq_len, batch), 0, input_size, dtype=jnp.int32)
    tok2 = jax.random.randint(k_tok2, (seq_len, batch), 0, input_size, dtype=jnp.int32)
    hidden0 = jnp.zeros((2, batch, hidden_size), jnp.float32)   # init_hidden(batch)

    # Two chained steps so both the embedding path and the recurrent (W_hh) path are exercised.
    out1, hidden1 = seq2seq_forward(tok1, hidden0, kparams)
    out2, hidden2 = seq2seq_forward(tok2, hidden1, kparams)
    jax.block_until_ready((out1, hidden1, out2, hidden2))

    assert out1.shape == (batch, output_size)
    assert out2.shape == (batch, output_size)
    assert hidden2.shape == (2, batch, hidden_size)
    assert bool(jnp.all(jnp.isfinite(out2))) and bool(jnp.all(jnp.isfinite(hidden2)))

    ref_out1, ref_h1 = _reference_forward(tok1, hidden0, raw)
    ref_out2, ref_h2 = _reference_forward(tok2, ref_h1, raw)
    tol = dict(atol=2e-2, rtol=2e-2)   # loosened for bf16 weight quantization (expected, per review)
    assert bool(jnp.allclose(out1, ref_out1, **tol))
    assert bool(jnp.allclose(hidden1, ref_h1, **tol))
    assert bool(jnp.allclose(out2, ref_out2, **tol))
    assert bool(jnp.allclose(hidden2, ref_h2, **tol))

    print("KERNEL_OK")
</pallas_src>

<mosaic_0001>
module attributes {stable_mosaic.version = 11 : i64} {
  func.func @seq2seq_kernel(%arg0: memref<8x1xi32, #tpu.memory_space<vmem>>, %arg1: memref<384x1024xbf16, #tpu.memory_space<vmem>>, %arg2: memref<2x8x32xf32, #tpu.memory_space<vmem>>, %arg3: memref<65x16xf32, #tpu.memory_space<vmem>>, %arg4: memref<8x16xf32, #tpu.memory_space<vmem>>, %arg5: memref<2x8x32xf32, #tpu.memory_space<vmem>>, %arg6: memref<8x384xf32, #tpu.memory_space<vmem>>) attributes {dimension_semantics = [], scalar_prefetch = 0 : i64, scratch_operands = 1 : i64, tpu.core_type = #tpu.core_type<tc>} {
    %0 = tpu.iota {dimensions = array<i32: 1>} : vector<8x384xi32>
    %c0 = arith.constant 0 : index
    %c0_0 = arith.constant 0 : index
    %1 = vector.load %arg0[%c0, %c0_0] : memref<8x1xi32, #tpu.memory_space<vmem>>, vector<8x1xi32>
    %2 = vector.broadcast %1 : vector<8x1xi32> to vector<8x384xi32>
    %3 = arith.cmpi eq, %0, %2 : vector<8x384xi32>
    %4 = arith.extui %3 : vector<8x384xi1> to vector<8x384xi32>
    %5 = arith.sitofp %4 : vector<8x384xi32> to vector<8x384xf32>
    %c160_i32 = arith.constant 160 : i32
    %6 = vector.broadcast %c160_i32 : i32 to vector<8x384xi32>
    %7 = arith.cmpi eq, %0, %6 : vector<8x384xi32>
    %8 = arith.extui %7 : vector<8x384xi1> to vector<8x384xi32>
    %9 = arith.sitofp %8 : vector<8x384xi32> to vector<8x384xf32>
    %10 = arith.addf %5, %9 : vector<8x384xf32>
    %c0_1 = arith.constant 0 : index
    %c0_2 = arith.constant 0 : index
    %11 = vector.load %arg6[%c0_1, %c0_2] : memref<8x384xf32, #tpu.memory_space<vmem>>, vector<8x384xf32>
    tpu.vector_store %arg6[%c0_1, %c0_2], %10 {strides = array<i32>} : memref<8x384xf32, #tpu.memory_space<vmem>>, vector<8x384xf32>,
    %c0_3 = arith.constant 0 : index
    %c0_4 = arith.constant 0 : index
    %c0_5 = arith.constant 0 : index
    %12 = vector.load %arg2[%c0_3, %c0_4, %c0_5] : memref<2x8x32xf32, #tpu.memory_space<vmem>>, vector<1x8x32xf32>
    %13 = vector.shape_cast %12 : vector<1x8x32xf32> to vector<8x32xf32>
    %c0_6 = arith.constant 0 : index
    %c128 = arith.constant 128 : index
    %14 = vector.load %arg6[%c0_6, %c128] : memref<8x384xf32, #tpu.memory_space<vmem>>, vector<8x32xf32>
    tpu.vector_store %arg6[%c0_6, %c128], %13 {strides = array<i32>} : memref<8x384xf32, #tpu.memory_space<vmem>>, vector<8x32xf32>,
    %c1 = arith.constant 1 : index
    %c0_7 = arith.constant 0 : index
    %c0_8 = arith.constant 0 : index
    %15 = vector.load %arg2[%c1, %c0_7, %c0_8] : memref<2x8x32xf32, #tpu.memory_space<vmem>>, vector<1x8x32xf32>
    %16 = vector.shape_cast %15 : vector<1x8x32xf32> to vector<8x32xf32>
    %c0_9 = arith.constant 0 : index
    %c256 = arith.constant 256 : index
    %17 = vector.load %arg6[%c0_9, %c256] : memref<8x384xf32, #tpu.memory_space<vmem>>, vector<8x32xf32>
    tpu.vector_store %arg6[%c0_9, %c256], %16 {strides = array<i32>} : memref<8x384xf32, #tpu.memory_space<vmem>>, vector<8x32xf32>,
    %c0_10 = arith.constant 0 : index
    %c0_11 = arith.constant 0 : index
    %18 = vector.load %arg6[%c0_10, %c0_11] : memref<8x384xf32, #tpu.memory_space<vmem>>, vector<8x384xf32>
    %19 = arith.truncf %18 : vector<8x384xf32> to vector<8x384xbf16>
    %c0_12 = arith.constant 0 : index
    %c0_13 = arith.constant 0 : index
    %20 = vector.load %arg1[%c0_12, %c0_13] : memref<384x1024xbf16, #tpu.memory_space<vmem>>, vector<384x1024xbf16>
    %cst = arith.constant dense<0.000000e+00> : vector<8x1024xf32>
    %21 = tpu.matmul %19, %20, %cst {dimension_numbers = #tpu.dot_dimension_numbers<[1], [0], [0], [1], [0, 0, 1, 1], [], []>} : vector<8x384xbf16>, vector<384x1024xbf16>, vector<8x1024xf32> -> vector<8x1024xf32>
    %c0_14 = arith.constant 0 : index
    %c0_15 = arith.constant 0 : index
    %c0_16 = arith.constant 0 : index
    %22 = vector.load %arg2[%c0_14, %c0_15, %c0_16] : memref<2x8x32xf32, #tpu.memory_space<vmem>>, vector<1x8x32xf32>
    %23 = vector.shape_cast %22 : vector<1x8x32xf32> to vector<8x32xf32>
    %24 = vector.extract_strided_slice %21 {offsets = [0, 0], sizes = [8, 32], strides = [1, 1]} : vector<8x1024xf32> to vector<8x32xf32>
    %25 = arith.negf %24 : vector<8x32xf32>
    %26 = math.exp %25 : vector<8x32xf32>
    %cst_17 = arith.constant 1.000000e+00 : f32
    %27 = vector.broadcast %cst_17 : f32 to vector<8x32xf32>
    %28 = arith.addf %27, %26 : vector<8x32xf32>
    %29 = arith.divf %27, %28 : vector<8x32xf32>
    %30 = vector.extract_strided_slice %21 {offsets = [0, 128], sizes = [8, 32], strides = [1, 1]} : vector<8x1024xf32> to vector<8x32xf32>
    %31 = arith.negf %30 : vector<8x32xf32>
    %32 = math.exp %31 : vector<8x32xf32>
    %cst_18 = arith.constant 1.000000e+00 : f32
    %33 = vector.broadcast %cst_18 : f32 to vector<8x32xf32>
    %34 = arith.addf %33, %32 : vector<8x32xf32>
    %35 = arith.divf %33, %34 : vector<8x32xf32>
    %36 = vector.extract_strided_slice %21 {offsets = [0, 256], sizes = [8, 32], strides = [1, 1]} : vector<8x1024xf32> to vector<8x32xf32>
    %37 = vector.extract_strided_slice %21 {offsets = [0, 384], sizes = [8, 32], strides = [1, 1]} : vector<8x1024xf32> to vector<8x32xf32>
    %38 = arith.mulf %29, %37 : vector<8x32xf32>
    %39 = arith.addf %36, %38 : vector<8x32xf32>
    %40 = math.tanh %39 : vector<8x32xf32>
    %cst_19 = arith.constant 1.000000e+00 : f32
    %41 = vector.broadcast %cst_19 : f32 to vector<8x32xf32>
    %42 = arith.subf %41, %35 : vector<8x32xf32>
    %43 = arith.mulf %42, %40 : vector<8x32xf32>
    %44 = arith.mulf %35, %23 : vector<8x32xf32>
    %45 = arith.addf %43, %44 : vector<8x32xf32>
    %c1_20 = arith.constant 1 : index
    %c0_21 = arith.constant 0 : index
    %c0_22 = arith.constant 0 : index
    %46 = vector.load %arg2[%c1_20, %c0_21, %c0_22] : memref<2x8x32xf32, #tpu.memory_space<vmem>>, vector<1x8x32xf32>
    %47 = vector.shape_cast %46 : vector<1x8x32xf32> to vector<8x32xf32>
    %48 = vector.extract_strided_slice %21 {offsets = [0, 512], sizes = [8, 32], strides = [1, 1]} : vector<8x1024xf32> to vector<8x32xf32>
    %49 = arith.negf %48 : vector<8x32xf32>
    %50 = math.exp %49 : vector<8x32xf32>
    %cst_23 = arith.constant 1.000000e+00 : f32
    %51 = vector.broadcast %cst_23 : f32 to vector<8x32xf32>
    %52 = arith.addf %51, %50 : vector<8x32xf32>
    %53 = arith.divf %51, %52 : vector<8x32xf32>
    %54 = vector.extract_strided_slice %21 {offsets = [0, 640], sizes = [8, 32], strides = [1, 1]} : vector<8x1024xf32> to vector<8x32xf32>
    %55 = arith.negf %54 : vector<8x32xf32>
    %56 = math.exp %55 : vector<8x32xf32>
    %cst_24 = arith.constant 1.000000e+00 : f32
    %57 = vector.broadcast %cst_24 : f32 to vector<8x32xf32>
    %58 = arith.addf %57, %56 : vector<8x32xf32>
    %59 = arith.divf %57, %58 : vector<8x32xf32>
    %60 = vector.extract_strided_slice %21 {offsets = [0, 768], sizes = [8, 32], strides = [1, 1]} : vector<8x1024xf32> to vector<8x32xf32>
    %61 = vector.extract_strided_slice %21 {offsets = [0, 896], sizes = [8, 32], strides = [1, 1]} : vector<8x1024xf32> to vector<8x32xf32>
    %62 = arith.mulf %53, %61 : vector<8x32xf32>
    %63 = arith.addf %60, %62 : vector<8x32xf32>
    %64 = math.tanh %63 : vector<8x32xf32>
    %cst_25 = arith.constant 1.000000e+00 : f32
    %65 = vector.broadcast %cst_25 : f32 to vector<8x32xf32>
    %66 = arith.subf %65, %59 : vector<8x32xf32>
    %67 = arith.mulf %66, %64 : vector<8x32xf32>
    %68 = arith.mulf %59, %47 : vector<8x32xf32>
    %69 = arith.addf %67, %68 : vector<8x32xf32>
    %c0_26 = arith.constant 0 : index
    %c0_27 = arith.constant 0 : index
    %c0_28 = arith.constant 0 : index
    %70 = vector.load %arg5[%c0_26, %c0_27, %c0_28] : memref<2x8x32xf32, #tpu.memory_space<vmem>>, vector<1x8x32xf32>
    %71 = vector.shape_cast %70 : vector<1x8x32xf32> to vector<8x32xf32>
    %72 = vector.shape_cast %45 : vector<8x32xf32> to vector<1x8x32xf32>
    tpu.vector_store %arg5[%c0_26, %c0_27, %c0_28], %72 {strides = array<i32>} : memref<2x8x32xf32, #tpu.memory_space<vmem>>, vector<1x8x32xf32>,
    %c1_29 = arith.constant 1 : index
    %c0_30 = arith.constant 0 : index
    %c0_31 = arith.constant 0 : index
    %73 = vector.load %arg5[%c1_29, %c0_30, %c0_31] : memref<2x8x32xf32, #tpu.memory_space<vmem>>, vector<1x8x32xf32>
    %74 = vector.shape_cast %73 : vector<1x8x32xf32> to vector<8x32xf32>
    %75 = vector.shape_cast %69 : vector<8x32xf32> to vector<1x8x32xf32>
    tpu.vector_store %arg5[%c1_29, %c0_30, %c0_31], %75 {strides = array<i32>} : memref<2x8x32xf32, #tpu.memory_space<vmem>>, vector<1x8x32xf32>,
    %c0_32 = arith.constant 0 : index
    %c0_33 = arith.constant 0 : index
    %76 = vector.load %arg3[%c0_32, %c0_33] : memref<65x16xf32, #tpu.memory_space<vmem>>, vector<32x16xf32>
    %cst_34 = arith.constant dense<0.000000e+00> : vector<8x16xf32>
    %77 = tpu.matmul %45, %76, %cst_34 {dimension_numbers = #tpu.dot_dimension_numbers<[1], [0], [0], [1], [0, 0, 1, 1], [], []>} : vector<8x32xf32>, vector<32x16xf32>, vector<8x16xf32> -> vector<8x16xf32>
    %c32 = arith.constant 32 : index
    %c0_35 = arith.constant 0 : index
    %78 = vector.load %arg3[%c32, %c0_35] : memref<65x16xf32, #tpu.memory_space<vmem>>, vector<32x16xf32>
    %cst_36 = arith.constant dense<0.000000e+00> : vector<8x16xf32>
    %79 = tpu.matmul %69, %78, %cst_36 {dimension_numbers = #tpu.dot_dimension_numbers<[1], [0], [0], [1], [0, 0, 1, 1], [], []>} : vector<8x32xf32>, vector<32x16xf32>, vector<8x16xf32> -> vector<8x16xf32>
    %80 = arith.addf %77, %79 : vector<8x16xf32>
    %c64 = arith.constant 64 : index
    %c0_37 = arith.constant 0 : index
    %81 = vector.load %arg3[%c64, %c0_37] : memref<65x16xf32, #tpu.memory_space<vmem>>, vector<1x16xf32>
    %82 = vector.broadcast %81 : vector<1x16xf32> to vector<8x16xf32>
    %83 = arith.addf %80, %82 : vector<8x16xf32>
    %c0_38 = arith.constant 0 : index
    %c0_39 = arith.constant 0 : index
    %84 = vector.load %arg4[%c0_38, %c0_39] : memref<8x16xf32, #tpu.memory_space<vmem>>, vector<8x16xf32>
    tpu.vector_store %arg4[%c0_38, %c0_39], %83 {strides = array<i32>} : memref<8x16xf32, #tpu.memory_space<vmem>>, vector<8x16xf32>,
    return
  }
}

</mosaic_0001>

<bundles_post_ra>
// kernel: seq2seq_forward.1
= control target key start
LH: loop header
LB: loop body
LE: loop exit
PB: predicated region body
PF: predicated region fallthrough
CT: control target
= control target key end

     0   :  { %11 = vsyncpa [#allocation4], 0  ;;  %s2402_s0 = inlined_call_operand.vmem [shape: s32[8,1], index: 0, kind: input, shape index: {}]   ;;  %s2403_s1 = inlined_call_operand.hbm [shape: bf16[384,1024], index: 1, kind: input, shape index: {}]   ;;  %s2404_s2 = inlined_call_operand.hbm [shape: f32[2,8,32], index: 2, kind: input, shape index: {}, may-alias: {2,5}]   ;;  %s2405_s3 = inlined_call_operand.vmem [shape: f32[65,16], index: 3, kind: input, shape index: {}]   ;;  %s2406_s4 = inlined_call_operand.hbm [shape: f32[8,16], index: 4, kind: output, shape index: {0}]   ;;  %s2407_s5 = inlined_call_operand.hbm [shape: f32[2,8,32], index: 5, kind: output, shape index: {1}, may-alias: {2,5}]  }
   0x1   :  { %12 = vsyncpa [#allocation7], 0 }
   0x2   :  { %13 = vsyncpa [#allocation5], 0 }
   0x3   :  { %14 = vsyncpa [#allocation10], 0  ;;  %s2203_s18 = smov [#allocation3]   ;;  %s2107_s22 = scalar_lea.hbm %s2403_s1, 24576 }
   0x4   :  { %s22_s19 = sshll.u32 %s2203_s18, 4  ;;  %p2108_p0 = scmp.ne.s32.totalorder %s2403_s1, %s2107_s22  ;;  %s23_s19 = int_to_ptr.vmem [resolvable:$true] %s22_s19 }
   0x5   :  { %p2111_p1 = scmp.lt.u32.totalorder %s2107_s22, %s2403_s1 }
   0x7   :  { %p2113_p2 = pnand %p2111_p1, %p2108_p0 }
   0x9   :  { %2116 = shalt.err (!%p2113_p2)
}
   0xa   :  { %s2117_s27 = scalar_lea.vmem %s23_s19, 24576  ;;  %p2122_p4 = scmp.lt.s32.totalorder %s23_s19, %s23_s19 }
   0xb   :  { %p2118_p3 = scmp.ne.s32.totalorder %s23_s19, %s2117_s27  ;;  %p2123_p5 = scmp.lt.s32.totalorder %s2117_s27, %s2117_s27 }
   0xd   :  { %p2124_p6 = por %p2123_p5, %p2122_p4 }
   0xf   :  { %p2125_p7 = pnand %p2124_p6, %p2118_p3 }
  0x11   :  { %2128 = shalt.err (!%p2125_p7)
}
  0x12   :  { %s2204_s28 = smov 512   ;;  %s2205_s29 = smov 32  }
  0x13   :  { %28 = dma.hbm_to_vmem [thread:$0]  %s2403_s1, 24576, %s23_s19, [#allocation4], %s2204_s28, %s2204_s28, %s2205_s29  }
  0x14   :  { %s2206_s7 = smov [#allocation6]   ;;  %s2129_s11 = scalar_lea.hbm %s2404_s2, 256 }
  0x15   :  { %s34_s8 = sshll.u32 %s2206_s7, 4  ;;  %p2130_p8 = scmp.ne.s32.totalorder %s2404_s2, %s2129_s11  ;;  %s35_s8 = int_to_ptr.vmem [resolvable:$true] %s34_s8 }
  0x16   :  { %p2133_p9 = scmp.lt.u32.totalorder %s2129_s11, %s2404_s2 }
  0x18   :  { %p2135_p10 = pnand %p2133_p9, %p2130_p8 }
  0x1a   :  { %2138 = shalt.err (!%p2135_p10)
}
  0x1b   :  { %s2139_s16 = scalar_lea.vmem %s35_s8, 256  ;;  %p2144_p12 = scmp.lt.s32.totalorder %s35_s8, %s35_s8 }
  0x1c   :  { %p2140_p11 = scmp.ne.s32.totalorder %s35_s8, %s2139_s16  ;;  %p2145_p13 = scmp.lt.s32.totalorder %s2139_s16, %s2139_s16 }
  0x1e   :  { %p2146_p0 = por %p2145_p13, %p2144_p12 }
  0x20   :  { %p2147_p1 = pnand %p2146_p0, %p2140_p11 }
  0x22   :  { %2150 = shalt.err (!%p2147_p1)
}
  0x23   :  { %s2207_s1 = smov 128   ;;  %s2208_s17 = smov 8  }
  0x24   :  { %40 = dma.hbm_to_vmem [thread:$0]  %s2404_s2, 256, %s35_s8, [#allocation7], %s2207_s1, %s2207_s1, %s2208_s17  }
  0x25   :  { %2195 = dma.done.wait [#allocation4], 24576  }
  0x26   :  { %2196 = vsyncadd [#allocation4], 4294942720 }
  0x27   :  { %2197 = dma.done.wait [#allocation7], 256  }
  0x28   :  { %2198 = vsyncadd [#allocation7], 4294967040  ;;  %v2209_v0 = vmov 0   ;;  %v54_v1 = vld [vmem:[%s2402_s0] sm:$0xff]  ;;  %v94_v2 = vld [vmem:[#allocation3] sm:$0xff]  ;;  %vm83_vm4 = vcmask 261120  }
  0x29   :  { %2078 = vset.pattern.permute.xlu0 %v2209_v0  ;;  %v98_v3 = vld [vmem:[#allocation3 + $0x20] sm:$0xff]  ;;  %v95_v5 = vld [vmem:[#allocation3 + $0x8] sm:$0xff]  ;;  %vm2213_vm6 = vmmov 0   ;;  %s2214_s11 = smov [#allocation9]  }
  0x2a   :  { %56 = vperm.xlu0 %2078, %v54_v1   ;;  %v1816_v4 = vcombine.high %v94_v2, %v98_v3  ;;  %v99_v6 = vld [vmem:[#allocation3 + $0x28] sm:$0xff]  ;;  %v1815_v7 = vcombine.low %v94_v2, %v98_v3  ;;  %v102_v8 = vld [vmem:[#allocation3 + $0x40] sm:$0xff]  ;;  %s1794_s12 = sshll.u32 %s2214_s11, 4  ;;  %s1795_s12 = int_to_ptr.vmem [resolvable:$true] %s1794_s12 }
  0x2b   :  { %v1818_v9 = vcombine.high %v95_v5, %v99_v6  ;;  %v1817_v10 = vcombine.low %v95_v5, %v99_v6  ;;  %v106_v11 = vld [vmem:[#allocation3 + $0x60] sm:$0xff]  ;;  %v103_v12 = vld [vmem:[#allocation3 + $0x48] sm:$0xff]  ;;  %s2151_s13 = scalar_lea.vmem %s1795_s12, 256  ;;  %p2156_p3 = scmp.lt.s32.totalorder %s1795_s12, %s1795_s12 }
  0x2c   :  { %v107_v13 = vld [vmem:[#allocation3 + $0x68] sm:$0xff]  ;;  %1246 = vmatprep.subr.bf16.mxu0 %v1816_v4  ;;  %v1824_v14 = vcombine.high %v102_v8, %v106_v11  ;;  %v110_v16 = vld [vmem:[#allocation3 + $0x80] sm:$0xff]  ;;  %v1823_v19 = vcombine.low %v102_v8, %v106_v11  ;;  %p2152_p2 = scmp.ne.s32.totalorder %s1795_s12, %s2151_s13  ;;  %p2157_p4 = scmp.lt.s32.totalorder %s2151_s13, %s2151_s13 }
  0x2d   :  { %v1826_v15 = vcombine.high %v103_v12, %v107_v13  ;;  %v114_v17 = vld [vmem:[#allocation3 + $0xa0] sm:$0xff]  ;;  %v111_v18 = vld [vmem:[#allocation3 + $0x88] sm:$0xff]  ;;  %1328 = vmatprep.subr.bf16.mxu1 %v1818_v9  ;;  %1247 = vmatpush1.bf16.msra.mxu0 %v1815_v7  ;;  %v1825_v21 = vcombine.low %v103_v12, %v107_v13 }
  0x2e   :  { %v115_v20 = vld [vmem:[#allocation3 + $0xa8] sm:$0xff]  ;;  %1329 = vmatpush1.bf16.msra.mxu1 %v1817_v10  ;;  %1248 = vmatprep.subr.bf16.mxu0 %v1824_v14  ;;  %v1832_v22 = vcombine.high %v110_v16, %v114_v17  ;;  %v118_v24 = vld [vmem:[#allocation3 + $0xc0] sm:$0xff]  ;;  %v1831_v28 = vcombine.low %v110_v16, %v114_v17  ;;  %p2158_p5 = por %p2157_p4, %p2156_p3 }
  0x2f   :  { %1330 = vmatprep.subr.bf16.mxu1 %v1826_v15  ;;  %v1834_v23 = vcombine.high %v111_v18, %v115_v20  ;;  %v122_v25 = vld [vmem:[#allocation3 + $0xe0] sm:$0xff]  ;;  %v119_v26 = vld [vmem:[#allocation3 + $0xc8] sm:$0xff]  ;;  %v1833_v29 = vcombine.low %v111_v18, %v115_v20 }
  0x30   :  { %v123_v27 = vld [vmem:[#allocation3 + $0xe8] sm:$0xff]  ;;  %v1840_v30 = vcombine.high %v118_v24, %v122_v25  ;;  %v126_v32 = vld [vmem:[#allocation3 + $0x100] sm:$0xff]  ;;  %v1839_v36 = vcombine.low %v118_v24, %v122_v25  ;;  %p2159_p6 = pnand %p2158_p5, %p2152_p2 }
  0x31   :  { %1249 = vmatpush1.bf16.msra.mxu0 %v1823_v19  ;;  %v1842_v31 = vcombine.high %v119_v26, %v123_v27  ;;  %v130_v33 = vld [vmem:[#allocation3 + $0x120] sm:$0xff]  ;;  %v127_v34 = vld [vmem:[#allocation3 + $0x108] sm:$0xff]  ;;  %v1841_v37 = vcombine.low %v119_v26, %v123_v27 }
  0x32   :  { %1331 = vmatpush1.bf16.msra.mxu1 %v1825_v21  ;;  %1250 = vmatprep.subr.bf16.mxu0 %v1832_v22  ;;  %v131_v35 = vld [vmem:[#allocation3 + $0x128] sm:$0xff]  ;;  %v1848_v38 = vcombine.high %v126_v32, %v130_v33  ;;  %v134_v40 = vld [vmem:[#allocation3 + $0x140] sm:$0xff]  ;;  %v1847_v44 = vcombine.low %v126_v32, %v130_v33 }
  0x33   :  { %1332 = vmatprep.subr.bf16.mxu1 %v1834_v23  ;;  %v1850_v39 = vcombine.high %v127_v34, %v131_v35  ;;  %v138_v41 = vld [vmem:[#allocation3 + $0x160] sm:$0xff]  ;;  %v135_v42 = vld [vmem:[#allocation3 + $0x148] sm:$0xff]  ;;  %v1849_v45 = vcombine.low %v127_v34, %v131_v35 }
  0x34   :  { %v139_v43 = vld [vmem:[#allocation3 + $0x168] sm:$0xff]  ;;  %v1856_v46 = vcombine.high %v134_v40, %v138_v41  ;;  %v142_v48 = vld [vmem:[#allocation3 + $0x180] sm:$0xff]  ;;  %v1855_v52 = vcombine.low %v134_v40, %v138_v41 }
  0x35   :  { %1251 = vmatpush1.bf16.msra.mxu0 %v1831_v28  ;;  %v1858_v47 = vcombine.high %v135_v42, %v139_v43  ;;  %v146_v49 = vld [vmem:[#allocation3 + $0x1a0] sm:$0xff]  ;;  %v143_v50 = vld [vmem:[#allocation3 + $0x188] sm:$0xff]  ;;  %v1857_v53 = vcombine.low %v135_v42, %v139_v43 }
  0x36   :  { %1333 = vmatpush1.bf16.msra.mxu1 %v1833_v29  ;;  %1252 = vmatprep.subr.bf16.mxu0 %v1840_v30  ;;  %v147_v51 = vld [vmem:[#allocation3 + $0x1a8] sm:$0xff]  ;;  %v1864_v54 = vcombine.high %v142_v48, %v146_v49  ;;  %v150_v55 = vld [vmem:[#allocation3 + $0x1c0] sm:$0xff]  ;;  %v1863_v2 = vcombine.low %v142_v48, %v146_v49 }
  0x37   :  { %1334 = vmatprep.subr.bf16.mxu1 %v1842_v31  ;;  %v154_v56 = vld [vmem:[#allocation3 + $0x1e0] sm:$0xff]  ;;  %v1866_v57 = vcombine.high %v143_v50, %v147_v51  ;;  %v151_v58 = vld [vmem:[#allocation3 + $0x1c8] sm:$0xff]  ;;  %v1865_v4 = vcombine.low %v143_v50, %v147_v51 }
  0x38   :  { %v2277_v59 = vld [vmem:[#allocation3 + $0x400] sm:$0xff]  ;;  %v155_v61 = vld [vmem:[#allocation3 + $0x1e8] sm:$0xff]  ;;  %v1872_v5 = vcombine.high %v150_v55, %v154_v56  ;;  %v1871_v11 = vcombine.low %v150_v55, %v154_v56 }
  0x39   :  { %1253 = vmatpush1.bf16.msra.mxu0 %v1839_v36  ;;  %v2279_v60 = vld [vmem:[#allocation3 + $0x420] sm:$0xff]  ;;  %v2283_v63 = vld [vmem:[#allocation3 + $0x408] sm:$0xff]  ;;  %v1874_v6 = vcombine.high %v151_v58, %v155_v61  ;;  %v1873_v12 = vcombine.low %v151_v58, %v155_v61 }
  0x3a   :  { %1335 = vmatpush1.bf16.msra.mxu1 %v1841_v37  ;;  %1254 = vmatprep.subr.bf16.mxu0 %v1848_v38  ;;  %v1943_v62 = vcombine.low %v2277_v59, %v2279_v60  ;;  %v2285_v1 = vld [vmem:[#allocation3 + $0x428] sm:$0xff]  ;;  %v158_v7 = vld [vmem:[#allocation3 + $0x200] sm:$0xff] }
  0x3b   :  { %1336 = vmatprep.subr.bf16.mxu1 %v1850_v39  ;;  %v1945_v3 = vcombine.low %v2283_v63, %v2285_v1  ;;  %v162_v8 = vld [vmem:[#allocation3 + $0x220] sm:$0xff]  ;;  %v159_v9 = vld [vmem:[#allocation3 + $0x208] sm:$0xff] }
  0x3c   :  { %v163_v10 = vld [vmem:[#allocation3 + $0x228] sm:$0xff]  ;;  %v1880_v13 = vcombine.high %v158_v7, %v162_v8  ;;  %v166_v15 = vld [vmem:[#allocation3 + $0x240] sm:$0xff]  ;;  %v1879_v19 = vcombine.low %v158_v7, %v162_v8 }
  0x3d   :  { %1255 = vmatpush1.bf16.msra.mxu0 %v1847_v44  ;;  %v1882_v14 = vcombine.high %v159_v9, %v163_v10  ;;  %v170_v16 = vld [vmem:[#allocation3 + $0x260] sm:$0xff]  ;;  %v167_v17 = vld [vmem:[#allocation3 + $0x248] sm:$0xff]  ;;  %v1881_v20 = vcombine.low %v159_v9, %v163_v10 }
  0x3e   :  { %1337 = vmatpush1.bf16.msra.mxu1 %v1849_v45  ;;  %1256 = vmatprep.subr.bf16.mxu0 %v1856_v46  ;;  %v171_v18 = vld [vmem:[#allocation3 + $0x268] sm:$0xff]  ;;  %v1888_v21 = vcombine.high %v166_v15, %v170_v16  ;;  %v174_v23 = vld [vmem:[#allocation3 + $0x280] sm:$0xff]  ;;  %v1887_v27 = vcombine.low %v166_v15, %v170_v16  ;;  %v1944_v16 = vcombine.high %v2277_v59, %v2279_v60 }
  0x3f   :  { %1338 = vmatprep.subr.bf16.mxu1 %v1858_v47  ;;  %v1890_v22 = vcombine.high %v167_v17, %v171_v18  ;;  %v178_v24 = vld [vmem:[#allocation3 + $0x2a0] sm:$0xff]  ;;  %v175_v25 = vld [vmem:[#allocation3 + $0x288] sm:$0xff]  ;;  %v1889_v28 = vcombine.low %v167_v17, %v171_v18  ;;  %v1946_v17 = vcombine.high %v2283_v63, %v2285_v1  ;;  %v50_v18 = vlaneseq }
  0x40   :  { %v179_v26 = vld [vmem:[#allocation3 + $0x2a8] sm:$0xff]  ;;  %v1896_v29 = vcombine.high %v174_v23, %v178_v24  ;;  %v182_v31 = vld [vmem:[#allocation3 + $0x2c0] sm:$0xff]  ;;  %v1895_v35 = vcombine.low %v174_v23, %v178_v24 }
  0x41   :  { %1257 = vmatpush1.bf16.msra.mxu0 %v1855_v52  ;;  %v1898_v30 = vcombine.high %v175_v25, %v179_v26  ;;  %v186_v32 = vld [vmem:[#allocation3 + $0x2e0] sm:$0xff]  ;;  %v183_v33 = vld [vmem:[#allocation3 + $0x2c8] sm:$0xff]  ;;  %v1897_v36 = vcombine.low %v175_v25, %v179_v26 }
  0x42   :  { %1339 = vmatpush1.bf16.msra.mxu1 %v1857_v53  ;;  %1258 = vmatprep.subr.bf16.mxu0 %v1864_v54  ;;  %v187_v34 = vld [vmem:[#allocation3 + $0x2e8] sm:$0xff]  ;;  %v1904_v37 = vcombine.high %v182_v31, %v186_v32  ;;  %v190_v39 = vld [vmem:[#allocation3 + $0x300] sm:$0xff]  ;;  %v1903_v43 = vcombine.low %v182_v31, %v186_v32 }
  0x43   :  { %1340 = vmatprep.subr.bf16.mxu1 %v1866_v57  ;;  %v1906_v38 = vcombine.high %v183_v33, %v187_v34  ;;  %v194_v40 = vld [vmem:[#allocation3 + $0x320] sm:$0xff]  ;;  %v191_v41 = vld [vmem:[#allocation3 + $0x308] sm:$0xff]  ;;  %v1905_v44 = vcombine.low %v183_v33, %v187_v34 }
  0x44   :  { %v195_v42 = vld [vmem:[#allocation3 + $0x328] sm:$0xff]  ;;  %v1912_v45 = vcombine.high %v190_v39, %v194_v40  ;;  %v198_v47 = vld [vmem:[#allocation3 + $0x340] sm:$0xff]  ;;  %v1911_v51 = vcombine.low %v190_v39, %v194_v40 }
  0x45   :  { %1259 = vmatpush1.bf16.msra.mxu0 %v1863_v2  ;;  %v1914_v46 = vcombine.high %v191_v41, %v195_v42  ;;  %v202_v48 = vld [vmem:[#allocation3 + $0x360] sm:$0xff]  ;;  %v199_v49 = vld [vmem:[#allocation3 + $0x348] sm:$0xff]  ;;  %v1913_v52 = vcombine.low %v191_v41, %v195_v42 }
  0x46   :  { %1341 = vmatpush1.bf16.msra.mxu1 %v1865_v4  ;;  %1260 = vmatprep.subr.bf16.mxu0 %v1872_v5  ;;  %v203_v50 = vld [vmem:[#allocation3 + $0x368] sm:$0xff]  ;;  %v1920_v53 = vcombine.high %v198_v47, %v202_v48  ;;  %v206_v55 = vld [vmem:[#allocation3 + $0x380] sm:$0xff]  ;;  %v1919_v61 = vcombine.low %v198_v47, %v202_v48 }
  0x47   :  { %1342 = vmatprep.subr.bf16.mxu1 %v1874_v6  ;;  %v1922_v54 = vcombine.high %v199_v49, %v203_v50  ;;  %v210_v56 = vld [vmem:[#allocation3 + $0x3a0] sm:$0xff]  ;;  %v207_v57 = vld [vmem:[#allocation3 + $0x388] sm:$0xff]  ;;  %v1921_v2 = vcombine.low %v199_v49, %v203_v50 }
  0x48   :  { %v211_v58 = vld [vmem:[#allocation3 + $0x3a8] sm:$0xff]  ;;  %v1928_v4 = vcombine.high %v206_v55, %v210_v56  ;;  %v214_v6 = vld [vmem:[#allocation3 + $0x3c0] sm:$0xff]  ;;  %v1927_v10 = vcombine.low %v206_v55, %v210_v56 }
  0x49   :  { %1261 = vmatpush1.bf16.msra.mxu0 %v1871_v11  ;;  %v1930_v5 = vcombine.high %v207_v57, %v211_v58  ;;  %v218_v7 = vld [vmem:[#allocation3 + $0x3e0] sm:$0xff]  ;;  %v215_v8 = vld [vmem:[#allocation3 + $0x3c8] sm:$0xff]  ;;  %v1929_v11 = vcombine.low %v207_v57, %v211_v58 }
  0x4a   :  { %1343 = vmatpush1.bf16.msra.mxu1 %v1873_v12  ;;  %1262 = vmatprep.subr.bf16.mxu0 %v1880_v13  ;;  %v219_v9 = vld [vmem:[#allocation3 + $0x3e8] sm:$0xff]  ;;  %v1936_v12 = vcombine.high %v214_v6, %v218_v7  ;;  %v234_v31 = vld [vmem:[#allocation3 + $0x460] sm:$0xff] }
  0x4b   :  { %1344 = vmatprep.subr.bf16.mxu1 %v1882_v14  ;;  %v1938_v13 = vcombine.high %v215_v8, %v219_v9  ;;  %v1935_v14 = vcombine.low %v214_v6, %v218_v7  ;;  %v1937_v15 = vcombine.low %v215_v8, %v219_v9  ;;  %v86_v25 = vld [vmem:[#allocation6 + $0x8] sm:$0xff]  ;;  %v242_v39 = vld [vmem:[#allocation3 + $0x4a0] sm:$0xff] }
  0x4c   :  { %v231_v32 = vld [vmem:[#allocation3 + $0x448] sm:$0xff]  ;;  %v246_v48 = vld [vmem:[#allocation3 + $0x4c0] sm:$0xff] }
  0x4d   :  { %1263 = vmatpush1.bf16.msra.mxu0 %v1879_v19  ;;  %v51_v19 = vand.u32 127, %v50_v18  ;;  %v235_v33 = vld [vmem:[#allocation3 + $0x468] sm:$0xff]  ;;  %v250_v49 = vld [vmem:[#allocation3 + $0x4e0] sm:$0xff] }
  0x4e   :  { %1345 = vmatpush1.bf16.msra.mxu1 %v1881_v20  ;;  %1264 = vmatprep.subr.bf16.mxu0 %v1888_v21  ;;  %v239_v40 = vld [vmem:[#allocation3 + $0x488] sm:$0xff]  ;;  %v254_v1 = vld [vmem:[#allocation3 + $0x500] sm:$0xff] }
  0x4f   :  { %1346 = vmatprep.subr.bf16.mxu1 %v1890_v22  ;;  %v52_v20 = vadd.s32 128, %v51_v19  ;;  %v53_v21 = vadd.s32 256, %v51_v19  ;;  %v2210_v22 = vmov 0.0   ;;  %v243_v41 = vld [vmem:[#allocation3 + $0x4a8] sm:$0xff]  ;;  %v262_v58 = vld [vmem:[#allocation3 + $0x540] sm:$0xff] }
  0x50   :  { %v1962_v47 = vcombine.high %v239_v40, %v243_v41  ;;  %v247_v50 = vld [vmem:[#allocation3 + $0x4c8] sm:$0xff]  ;;  %v1961_v60 = vcombine.low %v239_v40, %v243_v41  ;;  %v270_v9 = vld [vmem:[#allocation3 + $0x580] sm:$0xff]  ;;  %v109_v40 = vld [vmem:[#allocation3 + $0x78] sm:$0xff] }
  0x51   :  { %1265 = vmatpush1.bf16.msra.mxu0 %v1887_v27  ;;  %vm68_vm0 = vcmp.eq.s32.totalorder %v52_v20, 160  ;;  %v282_v18 = vld [vmem:[#allocation3 + $0x5e0] sm:$0xff] }
  0x52   :  { %1347 = vmatpush1.bf16.msra.mxu1 %v1889_v28  ;;  %1266 = vmatprep.subr.bf16.mxu0 %v1896_v29  ;;  %v1814_v23 = vsel %vm68_vm0, 1.0, %v2210_v22  ;;  %v2296_v28 = vld [vmem:[#allocation6] sm:$0xff] }
  0x53   :  { %1348 = vmatprep.subr.bf16.mxu1 %v1898_v30  ;;  %v230_v30 = vld [vmem:[#allocation3 + $0x440] sm:$0xff] }
  0x55   :  { %1267 = vmatpush1.bf16.msra.mxu0 %v1895_v35 }
  0x56   :  { %1349 = vmatpush1.bf16.msra.mxu1 %v1897_v36  ;;  %1268 = vmatprep.subr.bf16.mxu0 %v1904_v37  ;;  %v1952_v36 = vcombine.high %v230_v30, %v234_v31  ;;  %v1954_v37 = vcombine.high %v231_v32, %v235_v33 }
  0x57   :  { %1350 = vmatprep.subr.bf16.mxu1 %v1906_v38  ;;  %v238_v38 = vld [vmem:[#allocation3 + $0x480] sm:$0xff] }
  0x58   :  { %v1959_v59 = vcombine.low %v238_v38, %v242_v39 }
  0x59   :  { %1269 = vmatpush1.bf16.msra.mxu0 %v1903_v43  ;;  %v2211_v43 = vmov 1.0|1.0  }
  0x5a   :  { %1351 = vmatpush1.bf16.msra.mxu1 %v1905_v44  ;;  %1270 = vmatprep.subr.bf16.mxu0 %v1912_v45  ;;  %v1951_v44 = vcombine.low %v230_v30, %v234_v31  ;;  %v1953_v45 = vcombine.low %v231_v32, %v235_v33  ;;  %v101_v30 = vld [vmem:[#allocation3 + $0x38] sm:$0xff] }
  0x5b   :  { %1352 = vmatprep.subr.bf16.mxu1 %v1914_v46  ;;  %v1960_v46 = vcombine.high %v238_v38, %v242_v39  ;;  %v108_v38 = vld [vmem:[#allocation3 + $0x70] sm:$0xff]  ;;  %v105_v39 = vld [vmem:[#allocation3 + $0x58] sm:$0xff] }
  0x5d   :  { %1271 = vmatpush1.bf16.msra.mxu0 %v1911_v51  ;;  %v251_v51 = vld [vmem:[#allocation3 + $0x4e8] sm:$0xff] }
  0x5e   :  { %1353 = vmatpush1.bf16.msra.mxu1 %v1913_v52  ;;  %1272 = vmatprep.subr.bf16.mxu0 %v1920_v53  ;;  %v1970_v63 = vcombine.high %v247_v50, %v251_v51  ;;  %v255_v52 = vld [vmem:[#allocation3 + $0x508] sm:$0xff]  ;;  %v1969_v55 = vcombine.low %v247_v50, %v251_v51  ;;  %v113_v50 = vld [vmem:[#allocation3 + $0x98] sm:$0xff] }
  0x5f   :  { %1354 = vmatprep.subr.bf16.mxu1 %v1922_v54  ;;  %v259_v53 = vld [vmem:[#allocation3 + $0x528] sm:$0xff]  ;;  %v1967_v54 = vcombine.low %v246_v48, %v250_v49  ;;  %v117_v51 = vld [vmem:[#allocation3 + $0xb8] sm:$0xff] }
  0x60   :  { %v1978_v57 = vcombine.high %v255_v52, %v259_v53  ;;  %v1977_v6 = vcombine.low %v255_v52, %v259_v53  ;;  %v121_v52 = vld [vmem:[#allocation3 + $0xd8] sm:$0xff] }
  0x61   :  { %1273 = vmatpush1.bf16.msra.mxu0 %v1919_v61  ;;  %v266_v61 = vld [vmem:[#allocation3 + $0x560] sm:$0xff]  ;;  %v125_v53 = vld [vmem:[#allocation3 + $0xf8] sm:$0xff] }
  0x62   :  { %1355 = vmatpush1.bf16.msra.mxu1 %v1921_v2  ;;  %1274 = vmatprep.subr.bf16.mxu0 %v1928_v4  ;;  %v263_v2 = vld [vmem:[#allocation3 + $0x548] sm:$0xff]  ;;  %v1984_v7 = vcombine.high %v262_v58, %v266_v61 }
  0x63   :  { %1356 = vmatprep.subr.bf16.mxu1 %v1930_v5  ;;  %v267_v4 = vld [vmem:[#allocation3 + $0x568] sm:$0xff] }
  0x64   :  { %v1986_v8 = vcombine.high %v263_v2, %v267_v4 }
  0x65   :  { %1275 = vmatpush1.bf16.msra.mxu0 %v1927_v10  ;;  %v274_v10 = vld [vmem:[#allocation3 + $0x5a0] sm:$0xff] }
  0x66   :  { %1357 = vmatpush1.bf16.msra.mxu1 %v1929_v11  ;;  %1276 = vmatprep.subr.bf16.mxu0 %v1936_v12  ;;  %v271_v11 = vld [vmem:[#allocation3 + $0x588] sm:$0xff] }
  0x67   :  { %1358 = vmatprep.subr.bf16.mxu1 %v1938_v13  ;;  %v275_v12 = vld [vmem:[#allocation3 + $0x5a8] sm:$0xff]  ;;  %v1983_v13 = vcombine.low %v262_v58, %v266_v61  ;;  %v128_v58 = vld [vmem:[#allocation3 + $0x110] sm:$0xff] }
  0x68   :  { %v132_v61 = vld [vmem:[#allocation3 + $0x130] sm:$0xff] }
  0x69   :  { %1277 = vmatpush1.bf16.msra.mxu0 %v1935_v14  ;;  %v1985_v14 = vcombine.low %v263_v2, %v267_v4  ;;  %v129_v2 = vld [vmem:[#allocation3 + $0x118] sm:$0xff] }
  0x6a   :  { %1359 = vmatpush1.bf16.msra.mxu1 %v1937_v15  ;;  %1287 = vmatprep.subr.bf16.mxu0 %v1944_v16  ;;  %v1992_v15 = vcombine.high %v270_v9, %v274_v10  ;;  %v1994_v16 = vcombine.high %v271_v11, %v275_v12  ;;  %v133_v4 = vld [vmem:[#allocation3 + $0x138] sm:$0xff] }
  0x6b   :  { %1369 = vmatprep.subr.bf16.mxu1 %v1946_v17  ;;  %v278_v17 = vld [vmem:[#allocation3 + $0x5c0] sm:$0xff] }
  0x6c   :  { %v1999_v31 = vcombine.low %v278_v17, %v282_v18 }
  0xa9   :  { %v57_v24 = vpop.permute.xlu0 %56 }
  0xaa   :  { %vm58_vm1 = vcmp.eq.s32.totalorder %v51_v19, %v57_v24  ;;  %vm59_vm2 = vcmp.eq.s32.totalorder %v52_v20, %v57_v24  ;;  %vm60_vm3 = vcmp.eq.s32.totalorder %v53_v21, %v57_v24  ;;  %v279_v19 = vld [vmem:[#allocation3 + $0x5c8] sm:$0xff]  ;;  %v1991_v21 = vcombine.low %v270_v9, %v274_v10  ;;  %v140_v9 = vld [vmem:[#allocation3 + $0x170] sm:$0xff]  ;;  %v137_v10 = vld [vmem:[#allocation3 + $0x158] sm:$0xff] }
  0xab   :  { %v1812_v26 = vsel %vm59_vm2, 1.0, %v2210_v22  ;;  %v1813_v27 = vsel %vm60_vm3, 1.0, %v2210_v22  ;;  %vm2307_vm5 = vmpackc.low %vm58_vm1, %vm58_vm1  ;;  %v283_v20 = vld [vmem:[#allocation3 + $0x5e8] sm:$0xff]  ;;  %v2000_v24 = vcombine.high %v278_v17, %v282_v18  ;;  %v148_v17 = vld [vmem:[#allocation3 + $0x1b0] sm:$0xff] }
  0xac   :  { %v77_v29 = vadd.f32 %v1814_v23, %v1812_v26  ;;  %81 = vst [vmem:[#allocation2 + $0x10] sm:$0xff] %v1813_v27  ;;  %v1993_v23 = vcombine.low %v271_v11, %v275_v12  ;;  %v96_v26 = vld [vmem:[#allocation3 + $0x10] sm:$0xff]  ;;  %v2001_v32 = vcombine.low %v279_v19, %v283_v20  ;;  %v141_v11 = vld [vmem:[#allocation3 + $0x178] sm:$0xff]  ;;  %v1851_v12 = vcombine.low %v128_v58, %v132_v61 }
  0xad   :  { %87 = vst.msk [vmem:[#allocation2 + $0x10] sm:$0xff] %vm83_vm4, %v86_v25  ;;  %v2002_v25 = vcombine.high %v279_v19, %v283_v20  ;;  %v100_v27 = vld [vmem:[#allocation3 + $0x30] sm:$0xff]  ;;  %v145_v18 = vld [vmem:[#allocation3 + $0x198] sm:$0xff] }
  0xae   :  { %80 = vst [vmem:[#allocation2 + $0x8] sm:$0xff] %v77_v29  ;;  %v97_v29 = vld [vmem:[#allocation3 + $0x18] sm:$0xff] }
  0xaf   :  { %84 = vst.msk [vmem:[#allocation2 + $0x8] sm:$0xff] %vm83_vm4, %v2296_v28  ;;  %v149_v19 = vld [vmem:[#allocation3 + $0x1b8] sm:$0xff] }
  0xb4   :  { %v90_v33 = vld [vmem:[#allocation2 + $0x10] sm:$0xff] }
  0xb5   :  { %v2325_v41 = vpack.c.bf16 %v90_v33, %v90_v33 }
  0xb6   :  { %v89_v34 = vld [vmem:[#allocation2 + $0x8] sm:$0xff] }
  0xb7   :  { %v2301_v35 = vpack.c.bf16 %v89_v34, %v89_v34  ;;  %v1820_v34 = vcombine.high %v96_v26, %v100_v27 }
  0xb9   :  { %1278 = vmatprep.mubr.bf16.mxu0 %v2301_v35  ;;  %1360 = vmatprep.mubr.bf16.mxu1 %v2301_v35 }
  0xba   :  { %2100 = vmatmul.mubr.msk.bf16.vlgmr.msra.gmra.mrb[0].mxu0 %vm2307_vm5, %v2211_v43  ;;  %2102 = vmatmul.mubr.msk.bf16.vlgmr.msra.gmra.mrb[0].mxu1 %vm2307_vm5, %v2211_v43 }
  0xbb   :  { %1288 = vmatpush1.bf16.msra.mxu0 %v1943_v62  ;;  %1370 = vmatpush1.bf16.msra.mxu1 %v1945_v3  ;;  %v1968_v62 = vcombine.high %v246_v48, %v250_v49  ;;  %v258_v3 = vld [vmem:[#allocation3 + $0x520] sm:$0xff]  ;;  %v112_v48 = vld [vmem:[#allocation3 + $0x90] sm:$0xff] }
  0xbc   :  { %1289 = vmatprep.subr.bf16.mxu0 %v1952_v36  ;;  %1371 = vmatprep.subr.bf16.mxu1 %v1954_v37  ;;  %v1976_v56 = vcombine.high %v254_v1, %v258_v3  ;;  %v1975_v5 = vcombine.low %v254_v1, %v258_v3  ;;  %v1822_v36 = vcombine.high %v97_v29, %v101_v30  ;;  %v104_v37 = vld [vmem:[#allocation3 + $0x50] sm:$0xff] }
  0xbd   :  { %1319 = vmatprep.mubr.bf16.mxu0 %v2209_v0  ;;  %1401 = vmatprep.mubr.bf16.mxu1 %v2209_v0  ;;  %v116_v49 = vld [vmem:[#allocation3 + $0xb0] sm:$0xff] }
  0xbe   :  { %v120_v1 = vld [vmem:[#allocation3 + $0xd0] sm:$0xff] }
  0xbf   :  { %1290 = vmatpush1.bf16.msra.mxu0 %v1951_v44  ;;  %1372 = vmatpush1.bf16.msra.mxu1 %v1953_v45  ;;  %v1819_v44 = vcombine.low %v96_v26, %v100_v27  ;;  %v1821_v45 = vcombine.low %v97_v29, %v101_v30  ;;  %v124_v3 = vld [vmem:[#allocation3 + $0xf0] sm:$0xff]  ;;  %v153_v27 = vld [vmem:[#allocation3 + $0x1d8] sm:$0xff] }
  0xc0   :  { %1291 = vmatprep.subr.bf16.mxu0 %v1960_v46  ;;  %1373 = vmatprep.subr.bf16.mxu1 %v1962_v47  ;;  %v1828_v46 = vcombine.high %v104_v37, %v108_v38  ;;  %v1830_v47 = vcombine.high %v105_v39, %v109_v40  ;;  %v156_v26 = vld [vmem:[#allocation3 + $0x1f0] sm:$0xff]  ;;  %v157_v29 = vld [vmem:[#allocation3 + $0x1f8] sm:$0xff] }
  0xc1   :  { %v1878_v33 = vcombine.high %v153_v27, %v157_v29 }
  0xc3   :  { %1292 = vmatpush1.bf16.msra.mxu0 %v1959_v59  ;;  %1374 = vmatpush1.bf16.msra.mxu1 %v1961_v60  ;;  %v1827_v59 = vcombine.low %v104_v37, %v108_v38  ;;  %v1829_v60 = vcombine.low %v105_v39, %v109_v40  ;;  %v161_v37 = vld [vmem:[#allocation3 + $0x218] sm:$0xff]  ;;  %v1877_v40 = vcombine.low %v153_v27, %v157_v29 }
  0xc4   :  { %1293 = vmatprep.subr.bf16.mxu0 %v1968_v62  ;;  %1375 = vmatprep.subr.bf16.mxu1 %v1970_v63  ;;  %v1836_v62 = vcombine.high %v112_v48, %v116_v49  ;;  %v1838_v63 = vcombine.high %v113_v50, %v117_v51  ;;  %v165_v38 = vld [vmem:[#allocation3 + $0x238] sm:$0xff] }
  0xc7   :  { %1294 = vmatpush1.bf16.msra.mxu0 %v1967_v54  ;;  %1376 = vmatpush1.bf16.msra.mxu1 %v1969_v55  ;;  %v1835_v54 = vcombine.low %v112_v48, %v116_v49  ;;  %v1837_v55 = vcombine.low %v113_v50, %v117_v51  ;;  %v169_v48 = vld [vmem:[#allocation3 + $0x258] sm:$0xff]  ;;  %v1885_v51 = vcombine.low %v161_v37, %v165_v38 }
  0xc8   :  { %1295 = vmatprep.subr.bf16.mxu0 %v1976_v56  ;;  %1377 = vmatprep.subr.bf16.mxu1 %v1978_v57  ;;  %v1844_v56 = vcombine.high %v120_v1, %v124_v3  ;;  %v1846_v57 = vcombine.high %v121_v52, %v125_v53  ;;  %v173_v49 = vld [vmem:[#allocation3 + $0x278] sm:$0xff] }
  0xcb   :  { %1296 = vmatpush1.bf16.msra.mxu0 %v1975_v5  ;;  %1378 = vmatpush1.bf16.msra.mxu1 %v1977_v6  ;;  %v1843_v5 = vcombine.low %v120_v1, %v124_v3  ;;  %v1845_v6 = vcombine.low %v121_v52, %v125_v53  ;;  %v177_v1 = vld [vmem:[#allocation3 + $0x298] sm:$0xff]  ;;  %v1893_v53 = vcombine.low %v169_v48, %v173_v49 }
  0xcc   :  { %1297 = vmatprep.subr.bf16.mxu0 %v1984_v7  ;;  %1379 = vmatprep.subr.bf16.mxu1 %v1986_v8  ;;  %v1852_v7 = vcombine.high %v128_v58, %v132_v61  ;;  %v136_v8 = vld [vmem:[#allocation3 + $0x150] sm:$0xff]  ;;  %v181_v3 = vld [vmem:[#allocation3 + $0x2b8] sm:$0xff] }
  0xcd   :  { %v1859_v20 = vcombine.low %v136_v8, %v140_v9  ;;  %v185_v58 = vld [vmem:[#allocation3 + $0x2d8] sm:$0xff] }
  0xce   :  { %v189_v61 = vld [vmem:[#allocation3 + $0x2f8] sm:$0xff] }
  0xcf   :  { %1298 = vmatpush1.bf16.msra.mxu0 %v1983_v13  ;;  %1380 = vmatpush1.bf16.msra.mxu1 %v1985_v14  ;;  %v1853_v13 = vcombine.low %v129_v2, %v133_v4  ;;  %v1860_v14 = vcombine.high %v136_v8, %v140_v9  ;;  %v193_v8 = vld [vmem:[#allocation3 + $0x318] sm:$0xff] }
  0xd0   :  { %1299 = vmatprep.subr.bf16.mxu0 %v1992_v15  ;;  %1381 = vmatprep.subr.bf16.mxu1 %v1994_v16  ;;  %v1862_v15 = vcombine.high %v137_v10, %v141_v11  ;;  %v144_v16 = vld [vmem:[#allocation3 + $0x190] sm:$0xff]  ;;  %v197_v9 = vld [vmem:[#allocation3 + $0x338] sm:$0xff] }
  0xd1   :  { %v1867_v30 = vcombine.low %v144_v16, %v148_v17 }
  0xd3   :  { %1300 = vmatpush1.bf16.msra.mxu0 %v1991_v21  ;;  %1382 = vmatpush1.bf16.msra.mxu1 %v1993_v23  ;;  %v1861_v21 = vcombine.low %v137_v10, %v141_v11  ;;  %v1868_v23 = vcombine.high %v144_v16, %v148_v17  ;;  %v1909_v11 = vcombine.low %v185_v58, %v189_v61  ;;  %v201_v16 = vld [vmem:[#allocation3 + $0x358] sm:$0xff] }
  0xd4   :  { %1301 = vmatprep.subr.bf16.mxu0 %v2000_v24  ;;  %1383 = vmatprep.subr.bf16.mxu1 %v2002_v25  ;;  %v1870_v24 = vcombine.high %v145_v18, %v149_v19  ;;  %v152_v25 = vld [vmem:[#allocation3 + $0x1d0] sm:$0xff]  ;;  %v205_v17 = vld [vmem:[#allocation3 + $0x378] sm:$0xff] }
  0xd5   :  { %v1875_v39 = vcombine.low %v152_v25, %v156_v26  ;;  %v1925_v29 = vcombine.low %v201_v16, %v205_v17 }
  0xd7   :  { %1302 = vmatpush1.bf16.msra.mxu0 %v1999_v31  ;;  %1384 = vmatpush1.bf16.msra.mxu1 %v2001_v32  ;;  %v1869_v31 = vcombine.low %v145_v18, %v149_v19  ;;  %v1876_v32 = vcombine.high %v152_v25, %v156_v26  ;;  %v1917_v19 = vcombine.low %v193_v8, %v197_v9  ;;  %v209_v25 = vld [vmem:[#allocation3 + $0x398] sm:$0xff] }
  0xd8   :  { %1410 = vmatprep.subr.bf16.mxu0 %v1820_v34  ;;  %1492 = vmatprep.subr.bf16.mxu1 %v1822_v36  ;;  %v160_v34 = vld [vmem:[#allocation3 + $0x210] sm:$0xff]  ;;  %v213_v26 = vld [vmem:[#allocation3 + $0x3b8] sm:$0xff] }
  0xd9   :  { %v164_v36 = vld [vmem:[#allocation3 + $0x230] sm:$0xff] }
  0xda   :  { %1320 = vmatmul.mubr.bf16.vlgmr.msra.gmra.mrb[0].mxu0 %v2325_v41  ;;  %1402 = vmatmul.mubr.bf16.vlgmr.msra.gmra.mrb[4].mxu1 %v2325_v41  ;;  %v1883_v50 = vcombine.low %v160_v34, %v164_v36 }
  0xdb   :  { %1411 = vmatpush1.bf16.msra.mxu0 %v1819_v44  ;;  %1493 = vmatpush1.bf16.msra.mxu1 %v1821_v45  ;;  %v1884_v44 = vcombine.high %v160_v34, %v164_v36  ;;  %v1886_v45 = vcombine.high %v161_v37, %v165_v38  ;;  %v217_v34 = vld [vmem:[#allocation3 + $0x3d8] sm:$0xff]  ;;  %v1933_v38 = vcombine.low %v209_v25, %v213_v26 }
  0xdc   :  { %1412 = vmatprep.subr.bf16.mxu0 %v1828_v46  ;;  %1494 = vmatprep.subr.bf16.mxu1 %v1830_v47  ;;  %v168_v46 = vld [vmem:[#allocation3 + $0x250] sm:$0xff]  ;;  %v221_v36 = vld [vmem:[#allocation3 + $0x3f8] sm:$0xff] }
  0xdd   :  { %1442 = vmatprep.mubr.bf16.mxu0 %v2301_v35  ;;  %1524 = vmatprep.mubr.bf16.mxu1 %v2301_v35  ;;  %v1854_v35 = vcombine.high %v129_v2, %v133_v4  ;;  %v172_v47 = vld [vmem:[#allocation3 + $0x270] sm:$0xff]  ;;  %v1901_v4 = vcombine.low %v177_v1, %v181_v3 }
  0xde   :  { %v1891_v52 = vcombine.low %v168_v46, %v172_v47 }
  0xdf   :  { %1413 = vmatpush1.bf16.msra.mxu0 %v1827_v59  ;;  %1495 = vmatpush1.bf16.msra.mxu1 %v1829_v60  ;;  %v1892_v59 = vcombine.high %v168_v46, %v172_v47  ;;  %v1894_v60 = vcombine.high %v169_v48, %v173_v49  ;;  %v225_v46 = vld [vmem:[#allocation3 + $0x418] sm:$0xff]  ;;  %v1941_v49 = vcombine.low %v217_v34, %v221_v36 }
  0xe0   :  { %1414 = vmatprep.subr.bf16.mxu0 %v1836_v62  ;;  %1496 = vmatprep.subr.bf16.mxu1 %v1838_v63  ;;  %v176_v62 = vld [vmem:[#allocation3 + $0x290] sm:$0xff]  ;;  %v229_v47 = vld [vmem:[#allocation3 + $0x438] sm:$0xff] }
  0xe1   :  { %v180_v63 = vld [vmem:[#allocation3 + $0x2b0] sm:$0xff] }
  0xe2   :  { %v1899_v2 = vcombine.low %v176_v62, %v180_v63 }
  0xe3   :  { %1415 = vmatpush1.bf16.msra.mxu0 %v1835_v54  ;;  %1497 = vmatpush1.bf16.msra.mxu1 %v1837_v55  ;;  %v1900_v54 = vcombine.high %v176_v62, %v180_v63  ;;  %v1902_v55 = vcombine.high %v177_v1, %v181_v3  ;;  %v233_v62 = vld [vmem:[#allocation3 + $0x458] sm:$0xff]  ;;  %v1949_v3 = vcombine.low %v225_v46, %v229_v47 }
  0xe4   :  { %1416 = vmatprep.subr.bf16.mxu0 %v1844_v56  ;;  %1498 = vmatprep.subr.bf16.mxu1 %v1846_v57  ;;  %v184_v56 = vld [vmem:[#allocation3 + $0x2d0] sm:$0xff]  ;;  %v237_v63 = vld [vmem:[#allocation3 + $0x478] sm:$0xff] }
  0xe5   :  { %v188_v57 = vld [vmem:[#allocation3 + $0x2f0] sm:$0xff] }
  0xe6   :  { %v1907_v10 = vcombine.low %v184_v56, %v188_v57 }
  0xe7   :  { %1417 = vmatpush1.bf16.msra.mxu0 %v1843_v5  ;;  %1499 = vmatpush1.bf16.msra.mxu1 %v1845_v6  ;;  %v1908_v5 = vcombine.high %v184_v56, %v188_v57  ;;  %v1910_v6 = vcombine.high %v185_v58, %v189_v61  ;;  %v241_v56 = vld [vmem:[#allocation3 + $0x498] sm:$0xff]  ;;  %v1957_v61 = vcombine.low %v233_v62, %v237_v63 }
  0xe8   :  { %1418 = vmatprep.subr.bf16.mxu0 %v1852_v7  ;;  %1500 = vmatprep.subr.bf16.mxu1 %v1854_v35  ;;  %v192_v7 = vld [vmem:[#allocation3 + $0x310] sm:$0xff]  ;;  %v245_v57 = vld [vmem:[#allocation3 + $0x4b8] sm:$0xff] }
  0xe9   :  { %v196_v35 = vld [vmem:[#allocation3 + $0x330] sm:$0xff] }
  0xea   :  { %v1915_v18 = vcombine.low %v192_v7, %v196_v35 }
  0xeb   :  { %1419 = vmatpush1.bf16.msra.mxu0 %v1851_v12  ;;  %1501 = vmatpush1.bf16.msra.mxu1 %v1853_v13  ;;  %v1916_v12 = vcombine.high %v192_v7, %v196_v35  ;;  %v1918_v13 = vcombine.high %v193_v8, %v197_v9  ;;  %v249_v7 = vld [vmem:[#allocation3 + $0x4d8] sm:$0xff] }
  0xec   :  { %1420 = vmatprep.subr.bf16.mxu0 %v1860_v14  ;;  %1502 = vmatprep.subr.bf16.mxu1 %v1862_v15  ;;  %v200_v14 = vld [vmem:[#allocation3 + $0x350] sm:$0xff]  ;;  %v253_v35 = vld [vmem:[#allocation3 + $0x4f8] sm:$0xff] }
  0xed   :  { %v204_v15 = vld [vmem:[#allocation3 + $0x370] sm:$0xff]  ;;  %v1974_v9 = vcombine.high %v249_v7, %v253_v35 }
  0xee   :  { %v1923_v27 = vcombine.low %v200_v14, %v204_v15 }
  0xef   :  { %1421 = vmatpush1.bf16.msra.mxu0 %v1859_v20  ;;  %1503 = vmatpush1.bf16.msra.mxu1 %v1861_v21  ;;  %v1924_v20 = vcombine.high %v200_v14, %v204_v15  ;;  %v1926_v21 = vcombine.high %v201_v16, %v205_v17  ;;  %v1973_v15 = vcombine.low %v249_v7, %v253_v35  ;;  %v264_v17 = vld [vmem:[#allocation3 + $0x550] sm:$0xff] }
  0xf0   :  { %1422 = vmatprep.subr.bf16.mxu0 %v1868_v23  ;;  %1504 = vmatprep.subr.bf16.mxu1 %v1870_v24  ;;  %v208_v23 = vld [vmem:[#allocation3 + $0x390] sm:$0xff] }
  0xf1   :  { %v212_v24 = vld [vmem:[#allocation3 + $0x3b0] sm:$0xff] }
  0xf2   :  { %v1931_v37 = vcombine.low %v208_v23, %v212_v24 }
  0xf3   :  { %1423 = vmatpush1.bf16.msra.mxu0 %v1867_v30  ;;  %1505 = vmatpush1.bf16.msra.mxu1 %v1869_v31  ;;  %v1932_v30 = vcombine.high %v208_v23, %v212_v24  ;;  %v1934_v31 = vcombine.high %v209_v25, %v213_v26  ;;  %v272_v26 = vld [vmem:[#allocation3 + $0x590] sm:$0xff] }
  0xf4   :  { %1424 = vmatprep.subr.bf16.mxu0 %v1876_v32  ;;  %1506 = vmatprep.subr.bf16.mxu1 %v1878_v33  ;;  %v216_v32 = vld [vmem:[#allocation3 + $0x3d0] sm:$0xff] }
  0xf5   :  { %v220_v33 = vld [vmem:[#allocation3 + $0x3f0] sm:$0xff] }
  0xf6   :  { %v1939_v48 = vcombine.low %v216_v32, %v220_v33 }
  0xf7   :  { %1425 = vmatpush1.bf16.msra.mxu0 %v1875_v39  ;;  %1507 = vmatpush1.bf16.msra.mxu1 %v1877_v40  ;;  %v1940_v39 = vcombine.high %v216_v32, %v220_v33  ;;  %v1942_v40 = vcombine.high %v217_v34, %v221_v36  ;;  %v280_v36 = vld [vmem:[#allocation3 + $0x5d0] sm:$0xff] }
  0xf8   :  { %1426 = vmatprep.subr.bf16.mxu0 %v1884_v44  ;;  %1508 = vmatprep.subr.bf16.mxu1 %v1886_v45  ;;  %v224_v44 = vld [vmem:[#allocation3 + $0x410] sm:$0xff] }
  0xf9   :  { %v228_v45 = vld [vmem:[#allocation3 + $0x430] sm:$0xff] }
  0xfa   :  { %v1947_v1 = vcombine.low %v224_v44, %v228_v45 }
  0xfb   :  { %1427 = vmatpush1.bf16.msra.mxu0 %v1883_v50  ;;  %1509 = vmatpush1.bf16.msra.mxu1 %v1885_v51  ;;  %v1948_v50 = vcombine.high %v224_v44, %v228_v45  ;;  %v1950_v51 = vcombine.high %v225_v46, %v229_v47 }
  0xfc   :  { %1428 = vmatprep.subr.bf16.mxu0 %v1892_v59  ;;  %1510 = vmatprep.subr.bf16.mxu1 %v1894_v60  ;;  %v232_v59 = vld [vmem:[#allocation3 + $0x450] sm:$0xff] }
  0xfd   :  { %v236_v60 = vld [vmem:[#allocation3 + $0x470] sm:$0xff] }
  0xfe   :  { %v1955_v58 = vcombine.low %v232_v59, %v236_v60 }
  0xff   :  { %1429 = vmatpush1.bf16.msra.mxu0 %v1891_v52  ;;  %1511 = vmatpush1.bf16.msra.mxu1 %v1893_v53  ;;  %v1956_v52 = vcombine.high %v232_v59, %v236_v60  ;;  %v1958_v53 = vcombine.high %v233_v62, %v237_v63  ;;  %v2212_v59 = vmov 0.0|0.0   ;;  %v1620_v62 = vld [vmem:[%s2405_s3 + $0x18] sm:$0xff] }
 0x100   :  { %1430 = vmatprep.subr.bf16.mxu0 %v1900_v54  ;;  %1512 = vmatprep.subr.bf16.mxu1 %v1902_v55  ;;  %v240_v54 = vld [vmem:[#allocation3 + $0x490] sm:$0xff] }
 0x101   :  { %v244_v55 = vld [vmem:[#allocation3 + $0x4b0] sm:$0xff] }
 0x102   :  { %v1963_v42 = vcombine.low %v240_v54, %v244_v55 }
 0x103   :  { %1431 = vmatpush1.bf16.msra.mxu0 %v1899_v2  ;;  %1513 = vmatpush1.bf16.msra.mxu1 %v1901_v4  ;;  %v1964_v2 = vcombine.high %v240_v54, %v244_v55  ;;  %v1966_v4 = vcombine.high %v241_v56, %v245_v57  ;;  %v1622_v54 = vld [vmem:[%s2405_s3 + $0x28] sm:$0xff] }
 0x104   :  { %1432 = vmatprep.subr.bf16.mxu0 %v1908_v5  ;;  %1514 = vmatprep.subr.bf16.mxu1 %v1910_v6  ;;  %v248_v5 = vld [vmem:[#allocation3 + $0x4d0] sm:$0xff] }
 0x105   :  { %v252_v6 = vld [vmem:[#allocation3 + $0x4f0] sm:$0xff] }
 0x106   :  { %v1972_v8 = vcombine.high %v248_v5, %v252_v6  ;;  %v1971_v14 = vcombine.low %v248_v5, %v252_v6 }
 0x107   :  { %1433 = vmatpush1.bf16.msra.mxu0 %v1907_v10  ;;  %1515 = vmatpush1.bf16.msra.mxu1 %v1909_v11  ;;  %v256_v10 = vld [vmem:[#allocation3 + $0x510] sm:$0xff] }
 0x108   :  { %1434 = vmatprep.subr.bf16.mxu0 %v1916_v12  ;;  %1516 = vmatprep.subr.bf16.mxu1 %v1918_v13  ;;  %v260_v11 = vld [vmem:[#allocation3 + $0x530] sm:$0xff]  ;;  %v257_v12 = vld [vmem:[#allocation3 + $0x518] sm:$0xff] }
 0x109   :  { %v261_v13 = vld [vmem:[#allocation3 + $0x538] sm:$0xff]  ;;  %v1980_v16 = vcombine.high %v256_v10, %v260_v11 }
 0x10a   :  { %v1981_v23 = vcombine.low %v257_v12, %v261_v13 }
 0x10b   :  { %1435 = vmatpush1.bf16.msra.mxu0 %v1915_v18  ;;  %1517 = vmatpush1.bf16.msra.mxu1 %v1917_v19  ;;  %v268_v18 = vld [vmem:[#allocation3 + $0x570] sm:$0xff]  ;;  %v265_v19 = vld [vmem:[#allocation3 + $0x558] sm:$0xff] }
 0x10c   :  { %1436 = vmatprep.subr.bf16.mxu0 %v1924_v20  ;;  %1518 = vmatprep.subr.bf16.mxu1 %v1926_v21  ;;  %v269_v20 = vld [vmem:[#allocation3 + $0x578] sm:$0xff]  ;;  %v1979_v21 = vcombine.low %v256_v10, %v260_v11  ;;  %v1988_v24 = vcombine.high %v264_v17, %v268_v18 }
 0x10d   :  { %v1990_v25 = vcombine.high %v265_v19, %v269_v20  ;;  %v1989_v32 = vcombine.low %v265_v19, %v269_v20 }
 0x10f   :  { %1437 = vmatpush1.bf16.msra.mxu0 %v1923_v27  ;;  %1519 = vmatpush1.bf16.msra.mxu1 %v1925_v29  ;;  %v276_v27 = vld [vmem:[#allocation3 + $0x5b0] sm:$0xff]  ;;  %v273_v29 = vld [vmem:[#allocation3 + $0x598] sm:$0xff] }
 0x110   :  { %1438 = vmatprep.subr.bf16.mxu0 %v1932_v30  ;;  %1520 = vmatprep.subr.bf16.mxu1 %v1934_v31  ;;  %v277_v30 = vld [vmem:[#allocation3 + $0x5b8] sm:$0xff]  ;;  %v1987_v31 = vcombine.low %v264_v17, %v268_v18  ;;  %v1996_v33 = vcombine.high %v272_v26, %v276_v27 }
 0x111   :  { %v1998_v34 = vcombine.high %v273_v29, %v277_v30  ;;  %v1997_v44 = vcombine.low %v273_v29, %v277_v30 }
 0x113   :  { %1439 = vmatpush1.bf16.msra.mxu0 %v1931_v37  ;;  %1521 = vmatpush1.bf16.msra.mxu1 %v1933_v38  ;;  %v284_v37 = vld [vmem:[#allocation3 + $0x5f0] sm:$0xff]  ;;  %v281_v38 = vld [vmem:[#allocation3 + $0x5d8] sm:$0xff] }
 0x114   :  { %1440 = vmatprep.subr.bf16.mxu0 %v1940_v39  ;;  %1522 = vmatprep.subr.bf16.mxu1 %v1942_v40  ;;  %v285_v39 = vld [vmem:[#allocation3 + $0x5f8] sm:$0xff]  ;;  %v1995_v40 = vcombine.low %v272_v26, %v276_v27  ;;  %v2004_v45 = vcombine.high %v280_v36, %v284_v37  ;;  %v2003_v47 = vcombine.low %v280_v36, %v284_v37 }
 0x115   :  { %v2006_v46 = vcombine.high %v281_v38, %v285_v39 }
 0x117   :  { %1441 = vmatpush1.bf16.msra.mxu0 %v1939_v48  ;;  %1523 = vmatpush1.bf16.msra.mxu1 %v1941_v49  ;;  %v2005_v48 = vcombine.low %v281_v38, %v285_v39  ;;  %v1617_v49 = vld [vmem:[%s2405_s3] sm:$0xff] }
 0x118   :  { %1451 = vmatprep.subr.bf16.mxu0 %v1948_v50  ;;  %1533 = vmatprep.subr.bf16.mxu1 %v1950_v51  ;;  %v1618_v50 = vld [vmem:[%s2405_s3 + $0x8] sm:$0xff]  ;;  %v1619_v51 = vld [vmem:[%s2405_s3 + $0x10] sm:$0xff] }
 0x119   :  { %v2053_v60 = vpack.c.bf16 %v1618_v50, %v1617_v49 }
 0x11a   :  { %2104 = vmatmul.mubr.msk.bf16.vlgmr.msra.gmra.mrb[4].mxu0 %vm2307_vm5, %v2211_v43  ;;  %2106 = vmatmul.mubr.msk.bf16.vlgmr.msra.gmra.mrb[8].mxu1 %vm2307_vm5, %v2211_v43  ;;  %v1965_v43 = vcombine.low %v241_v56, %v245_v57 }
 0x11b   :  { %1452 = vmatpush1.bf16.msra.mxu0 %v1947_v1  ;;  %1534 = vmatpush1.bf16.msra.mxu1 %v1949_v3 }
 0x11c   :  { %1453 = vmatprep.subr.bf16.mxu0 %v1956_v52  ;;  %1535 = vmatprep.subr.bf16.mxu1 %v1958_v53  ;;  %v1621_v53 = vld [vmem:[%s2405_s3 + $0x20] sm:$0xff] }
 0x11d   :  { %1483 = vmatprep.mubr.bf16.mxu0 %v2209_v0  ;;  %1565 = vmatprep.mubr.bf16.mxu1 %v2209_v0  ;;  %v1982_v0 = vcombine.high %v257_v12, %v261_v13  ;;  %v2047_v57 = vpack.c.bf16 %v1622_v54, %v1621_v53 }
 0x11f   :  { %1454 = vmatpush1.bf16.msra.mxu0 %v1955_v58  ;;  %1536 = vmatpush1.bf16.msra.mxu1 %v1957_v61  ;;  %v1624_v58 = vld [vmem:[%s2405_s3 + $0x38] sm:$0xff] }
 0x120   :  { %1455 = vmatprep.subr.bf16.mxu0 %v1964_v2  ;;  %1537 = vmatprep.subr.bf16.mxu1 %v1966_v4 }
 0x123   :  { %1456 = vmatpush1.bf16.msra.mxu0 %v1963_v42  ;;  %1538 = vmatpush1.bf16.msra.mxu1 %v1965_v43 }
 0x124   :  { %1457 = vmatprep.subr.bf16.mxu0 %v1972_v8  ;;  %1539 = vmatprep.subr.bf16.mxu1 %v1974_v9 }
 0x127   :  { %1458 = vmatpush1.bf16.msra.mxu0 %v1971_v14  ;;  %1540 = vmatpush1.bf16.msra.mxu1 %v1973_v15 }
 0x128   :  { %1459 = vmatprep.subr.bf16.mxu0 %v1980_v16  ;;  %1541 = vmatprep.subr.bf16.mxu1 %v1982_v0 }
 0x12b   :  { %1460 = vmatpush1.bf16.msra.mxu0 %v1979_v21  ;;  %1542 = vmatpush1.bf16.msra.mxu1 %v1981_v23 }
 0x12c   :  { %1461 = vmatprep.subr.bf16.mxu0 %v1988_v24  ;;  %1543 = vmatprep.subr.bf16.mxu1 %v1990_v25 }
 0x12f   :  { %1462 = vmatpush1.bf16.msra.mxu0 %v1987_v31  ;;  %1544 = vmatpush1.bf16.msra.mxu1 %v1989_v32 }
 0x130   :  { %1463 = vmatprep.subr.bf16.mxu0 %v1996_v33  ;;  %1545 = vmatprep.subr.bf16.mxu1 %v1998_v34 }
 0x133   :  { %1464 = vmatpush1.bf16.msra.mxu0 %v1995_v40  ;;  %1546 = vmatpush1.bf16.msra.mxu1 %v1997_v44 }
 0x134   :  { %1465 = vmatprep.subr.bf16.mxu0 %v2004_v45  ;;  %1547 = vmatprep.subr.bf16.mxu1 %v2006_v46 }
 0x137   :  { %1466 = vmatpush1.bf16.msra.mxu0 %v2003_v47  ;;  %1548 = vmatpush1.bf16.msra.mxu1 %v2005_v48 }
 0x138   :  { %2052 = vmatprep.subr.bf16.mxu1 %v2212_v59  ;;  %2046 = vmatprep.subr.bf16.mxu0 %v2212_v59 }
 0x13a   :  { %1484 = vmatmul.mubr.bf16.vlgmr.msra.gmra.mrb[4].mxu0 %v2325_v41  ;;  %1566 = vmatmul.mubr.bf16.vlgmr.msra.gmra.mrb[12].mxu1 %v2325_v41  ;;  %v2056_v41 = vpack.c.bf16 %v1620_v62, %v1619_v51  ;;  %v1594_v51 = vld [vmem:[#allocation6 + $0x8] sm:$0xff] }
 0x13b   :  { %2043 = vmatprep.mubr.msk.f32.mxu1 %vm2213_vm6, %v2210_v22  ;;  %2032 = vmatprep.mubr.msk.f32.mxu0 %vm2213_vm6, %v2210_v22  ;;  %v1623_v22 = vld [vmem:[%s2405_s3 + $0x30] sm:$0xff] }
 0x13c   :  { %2054 = vmatpush3.bf16.msra.mxu1 %v2053_v60  ;;  %2048 = vmatpush3.bf16.msra.mxu0 %v2047_v57  ;;  %v2050_v42 = vpack.c.bf16 %v1624_v58, %v1623_v22 }
 0x13d   :  { %2055 = vmatprep.subr.bf16.mxu1 %v2212_v59  ;;  %2049 = vmatprep.subr.bf16.mxu0 %v2212_v59 }
 0x140   :  { %2057 = vmatpush3.bf16.msra.mxu1 %v2056_v41  ;;  %2051 = vmatpush3.bf16.msra.mxu0 %v2050_v42 }
 0x18d   :  { %v1362_v63 = vpop.f32.mrb[0].mxu1 }
 0x18e   :  { %v1364_v1 = vpop.f32.mrb[1].mxu1 }
 0x18f   :  { %v1366_v3 = vpop.f32.mrb[2].mxu1 }
 0x190   :  { %v1367_v52 = vpop.f32.mrb[3].mxu1 }
 0x1ad   :  { %v1321_v55 = vpop.f32.mrb[0].mxu0  ;;  %v1403_v56 = vpop.f32.mrb[4].mxu1 }
 0x1ae   :  { %v2007_v61 = vmul.f32 -1.442695, %v1321_v55  ;;  %v1404_v2 = vadd.f32 %v1403_v56, %v1362_v63  ;;  %v1323_v4 = vpop.f32.mrb[1].mxu0  ;;  %v1405_v5 = vpop.f32.mrb[5].mxu1 }
 0x1af   :  { %v1406_v6 = vadd.f32 %v1405_v5, %v1364_v1  ;;  %v1325_v7 = vpop.f32.mrb[2].mxu0  ;;  %v1407_v35 = vpop.f32.mrb[6].mxu1  ;;  %v2008_v9 = vmul.f32 -1.442695, %v1323_v4 }
 0x1b0   :  { %2079 = vpow2.f32 %v2007_v61  ;;  %v1326_v43 = vpop.f32.mrb[3].mxu0  ;;  %v1408_v8 = vpop.f32.mrb[7].mxu1 }
 0x1b1   :  { %2081 = vpow2.f32 %v2008_v9 }
 0x1ba   :  { %v2080_v10 = vpop.eup %2079 }
 0x1bb   :  { %v1578_v11 = vadd.f32 1.0, %v2080_v10  ;;  %v2082_v12 = vpop.eup %2081 }
 0x1bc   :  { %v1584_v13 = vadd.f32 1.0, %v2082_v12 }
 0x1bd   :  { %2083 = vrcp.f32 %v1578_v11 }
 0x1be   :  { %2085 = vrcp.f32 %v1584_v13 }
 0x1c7   :  { %v2084_v14 = vpop.eup %2083 }
 0x1c8   :  { %v1587_v15 = vmul.f32 %v2084_v14, %v1406_v6  ;;  %v2086_v0 = vpop.eup %2085 }
 0x1c9   :  { %v1590_v17 = vsub.f32 1.0, %v2086_v0  ;;  %v1592_v20 = vmul.f32 %v2086_v0, %v2296_v28 }
 0x1ca   :  { %v1588_v16 = vadd.f32 %v1587_v15, %v1404_v2 }
 0x1cc   :  { %2087 = vtanh.f32 %v1588_v16 }
 0x1d6   :  { %v2088_v18 = vpop.eup %2087 }
 0x1d7   :  { %v1591_v19 = vmul.f32 %v2088_v18, %v1590_v17 }
 0x1d9   :  { %v1593_v21 = vadd.f32 %v1592_v20, %v1591_v19 }
 0x1db   :  { %2044 = vmatmul.mubr.msk.f32.vlgmr.msra.gmra.mrb[16].mxu1 %vm83_vm4, %v1593_v21  ;;  %1614 = vst.msk [vmem:[#allocation9] sm:$0xff] %vm83_vm4, %v1593_v21 }
 0x1ed   :  { %v1526_v23 = vpop.f32.mrb[8].mxu1 }
 0x1ee   :  { %v1528_v24 = vpop.f32.mrb[9].mxu1 }
 0x1ef   :  { %v1530_v25 = vpop.f32.mrb[10].mxu1 }
 0x1f0   :  { %v1531_v26 = vpop.f32.mrb[11].mxu1 }
 0x20d   :  { %v1485_v27 = vpop.f32.mrb[4].mxu0  ;;  %v1567_v29 = vpop.f32.mrb[12].mxu1 }
 0x20e   :  { %v2009_v30 = vmul.f32 -1.442695, %v1485_v27  ;;  %v1568_v31 = vadd.f32 %v1567_v29, %v1526_v23  ;;  %v1487_v32 = vpop.f32.mrb[5].mxu0  ;;  %v1569_v33 = vpop.f32.mrb[13].mxu1 }
 0x20f   :  { %v1570_v34 = vadd.f32 %v1569_v33, %v1528_v24  ;;  %v1489_v36 = vpop.f32.mrb[6].mxu0  ;;  %v1571_v37 = vpop.f32.mrb[14].mxu1  ;;  %v2010_v39 = vmul.f32 -1.442695, %v1487_v32 }
 0x210   :  { %2089 = vpow2.f32 %v2009_v30  ;;  %v1490_v28 = vpop.f32.mrb[7].mxu0  ;;  %v1572_v38 = vpop.f32.mrb[15].mxu1 }
 0x211   :  { %2091 = vpow2.f32 %v2010_v39 }
 0x21a   :  { %v2090_v40 = vpop.eup %2089 }
 0x21b   :  { %v1598_v44 = vadd.f32 1.0, %v2090_v40  ;;  %v2092_v45 = vpop.eup %2091 }
 0x21c   :  { %v1604_v46 = vadd.f32 1.0, %v2092_v45 }
 0x21d   :  { %2093 = vrcp.f32 %v1598_v44 }
 0x21e   :  { %2095 = vrcp.f32 %v1604_v46 }
 0x227   :  { %v2094_v47 = vpop.eup %2093 }
 0x228   :  { %v1607_v48 = vmul.f32 %v2094_v47, %v1570_v34  ;;  %v2096_v50 = vpop.eup %2095 }
 0x229   :  { %v1610_v59 = vsub.f32 1.0, %v2096_v50  ;;  %v1612_v41 = vmul.f32 %v2096_v50, %v1594_v51 }
 0x22a   :  { %v1608_v49 = vadd.f32 %v1607_v48, %v1568_v31 }
 0x22c   :  { %2097 = vtanh.f32 %v1608_v49 }
 0x236   :  { %v2098_v60 = vpop.eup %2097 }
 0x237   :  { %v1611_v62 = vmul.f32 %v2098_v60, %v1610_v59 }
 0x239   :  { %v1613_v63 = vadd.f32 %v1612_v41, %v1611_v62 }
 0x23b   :  { %2033 = vmatmul.mubr.msk.f32.vlgmr.msra.gmra.mrb[8].mxu0 %vm83_vm4, %v1613_v63  ;;  %1616 = vst.msk [vmem:[#allocation9 + $0x8] sm:$0xff] %vm83_vm4, %v1613_v63 }
 0x23c   :  { %2162 = shalt.err (!%p2159_p6)
}
 0x23d   :  { %s2163_s16 = scalar_lea.hbm %s2407_s5, 256 }
 0x23e   :  { %p2164_p7 = scmp.ne.s32.totalorder %s2407_s5, %s2163_s16  ;;  %p2167_p8 = scmp.lt.u32.totalorder %s2163_s16, %s2407_s5 }
 0x240   :  { %p2169_p9 = pnand %p2167_p8, %p2164_p7 }
 0x242   :  { %2172 = shalt.err (!%p2169_p9)
}
 0x243   :  { %1800 = dma.vmem_to_hbm [thread:$0]  %s1795_s12, 256, %s2407_s5, [#allocation10], %s2207_s1, %s2207_s1, %s2208_s17   ;;  %vm1777_vm7 = vcmask 130048  }
 0x244   :  { %v2013_v53 = vld [vmem:[%s2405_s3 + $0x40] ss:$0 sm:$0xff]  ;;  %s2215_s24 = smov [#allocation8]  }
 0x245   :  { %s1785_s25 = sshll.u32 %s2215_s24, 4  ;;  %s1786_s25 = int_to_ptr.vmem [resolvable:$true] %s1785_s25 }
 0x246   :  { %s2173_s26 = scalar_lea.vmem %s1786_s25, 128  ;;  %p2178_p11 = scmp.lt.s32.totalorder %s1786_s25, %s1786_s25 }
 0x247   :  { %p2174_p10 = scmp.ne.s32.totalorder %s1786_s25, %s2173_s26  ;;  %p2179_p12 = scmp.lt.s32.totalorder %s2173_s26, %s2173_s26 }
 0x249   :  { %p2180_p13 = por %p2179_p12, %p2178_p11 }
 0x24b   :  { %p2181_p0 = pnand %p2180_p13, %p2174_p10 }
 0x2ae   :  { %v1767_v1 = vpop.f32.mrb[16].mxu1 }
 0x2af   :  { %v2045_v3 = vpop.f32.mrb[17].mxu1 }
 0x30e   :  { %v1694_v52 = vpop.f32.mrb[8].mxu0 }
 0x30f   :  { %v1768_v54 = vadd.f32 %v1767_v1, %v1694_v52  ;;  %v2034_v22 = vpop.f32.mrb[9].mxu0 }
 0x311   :  { %v1776_v55 = vadd.f32 %v2013_v53, %v1768_v54 }
 0x313   :  { %1778 = vst.msk [vmem:[#allocation8] sm:$0xff] %vm1777_vm7, %v1776_v55 }
 0x314   :  { %2184 = shalt.err (!%p2181_p0)
}
 0x315   :  { %s2185_s17 = scalar_lea.hbm %s2406_s4, 128 }
 0x316   :  { %p2186_p1 = scmp.ne.s32.totalorder %s2406_s4, %s2185_s17  ;;  %p2189_p2 = scmp.lt.u32.totalorder %s2185_s17, %s2406_s4 }
 0x318   :  { %p2191_p3 = pnand %p2189_p2, %p2186_p1 }
 0x31a   :  { %2194 = shalt.err (!%p2191_p3)
}
 0x31b   :  { %1788 = dma.vmem_to_hbm [thread:$0]  %s1786_s25, 128, %s2406_s4, [#allocation5]  }
 0x31c   :  { %2199 = dma.done.wait [#allocation5], 128  }
 0x31d   :  { %2200 = vsyncadd [#allocation5], 4294967168 }
 0x31e   :  { %2201 = dma.done.wait [#allocation10], 256  }
 0x31f   :  { %2202 = vsyncadd [#allocation10], 4294967040 }
 0x320   :  { %1807 = vsyncpa [#allocation4], 1 }
 0x321   :  { %1808 = vsyncpa [#allocation7], 1 }
 0x322   :  { %1809 = vsyncpa [#allocation5], 1 }
 0x323   :  { %1810 = vsyncpa [#allocation10], 1 }

</bundles_post_ra>
